<compile_context>
chip_gen: v7x
topology: tpu7x:2x2x1
jax: 0.10.0
libtpu: 0.0.40
codegen_flags: <defaults>
</compile_context>

<pallas_src>
import functools

import numpy as np
import jax
import jax.numpy as jnp
from jax.experimental import pallas as pl
from jax.experimental.pallas import tpu as pltpu


ACT_DTYPE = jnp.bfloat16          # inter-kernel activation dtype (halves HBM traffic)
VMEM_LIMIT = 48 * 1024 * 1024     # raised scoped-VMEM limit, still below v7x's 64 MiB part


# ----------------------------------------------------------------------------
# elementwise helpers (used inside kernels)
# ----------------------------------------------------------------------------
def _gelu(x):
    # tanh-approximate GELU (EUP tanh); ~1e-3 from torch's erf GELU.
    c = 0.7978845608028654
    return 0.5 * x * (1.0 + jnp.tanh(c * (x + 0.044715 * x * x * x)))


# ----------------------------------------------------------------------------
# tile selection helpers
# ----------------------------------------------------------------------------
def _pick_tile(dim, quantum, cap):
    """Largest divisor of `dim` that is a multiple of `quantum` and <= cap; else full dim."""
    if dim <= cap:
        return dim
    t = (cap // quantum) * quantum
    while t >= quantum:
        if dim % t == 0:
            return t
        t -= quantum
    return dim


def _pick_window_group(num_windows, n_tok, c, hidden, num_heads,
                       budget_bytes=20 * 1024 * 1024, max_rows=512):
    """Largest divisor of num_windows whose per-step VMEM footprint stays under budget."""
    # resident weights (double-buffered bf16) + relative bias (double-buffered f32)
    weights = 2 * 2 * (c * 3 * c + c * c + 2 * c * hidden) + 2 * 4 * num_heads * n_tok * n_tok

    def step_bytes(wg):
        rows = wg * n_tok
        blocks = 2 * 2 * rows * c * 2                     # in + out blocks (bf16, 2-buffered)
        scratch = rows * (3 * c + c) * 2                  # qkv + attn scratches (bf16)
        live = 2 * wg * n_tok * n_tok * 4 + rows * 4 * c * 4   # logits/exp + f32 temps
        return blocks + scratch + live

    best = 1
    for wg in range(1, num_windows + 1):
        if num_windows % wg:
            continue
        if wg * n_tok <= max_rows and weights + step_bytes(wg) <= budget_bytes:
            best = wg
    return best


# ----------------------------------------------------------------------------
# tiled matmul + bias (all 1x1 convs)
# ----------------------------------------------------------------------------
def _matmul_bias_kernel(x_ref, w_ref, b_ref, o_ref, acc_ref):
    @pl.when(pl.program_id(2) == 0)
    def _():
        acc_ref[...] = jnp.zeros_like(acc_ref)

    acc_ref[...] += jnp.dot(x_ref[...].astype(jnp.bfloat16), w_ref[...],
                            preferred_element_type=jnp.float32)

    @pl.when(pl.program_id(2) == pl.num_programs(2) - 1)
    def _():
        o_ref[...] = (acc_ref[...] + b_ref[...]).astype(o_ref.dtype)


def matmul_bias(x, w, b, out_dtype=ACT_DTYPE):
    """x: (M, K) @ w: (K, N) + b: (N,) -> (M, N), tiled + pipelined, bf16 MXU operands."""
    M, K = x.shape
    N = w.shape[1]
    tm = _pick_tile(M, 8, 1024)      # larger M tiles amortize per-step overhead (review item)
    tn = _pick_tile(N, 128, 512)
    tk = _pick_tile(K, 128, 512)
    grid = (M // tm, N // tn, K // tk)
    return pl.pallas_call(
        _matmul_bias_kernel,
        grid=grid,
        in_specs=[
            pl.BlockSpec((tm, tk), lambda i, j, k: (i, k)),
            pl.BlockSpec((tk, tn), lambda i, j, k: (k, j)),
            pl.BlockSpec((1, tn), lambda i, j, k: (0, j)),
        ],
        out_specs=pl.BlockSpec((tm, tn), lambda i, j, k: (i, j)),
        out_shape=jax.ShapeDtypeStruct((M, N), out_dtype),
        scratch_shapes=[pltpu.VMEM((tm, tn), jnp.float32)],
        compiler_params=pltpu.CompilerParams(
            dimension_semantics=("parallel", "parallel", "arbitrary"),
            vmem_limit_bytes=VMEM_LIMIT),
    )(x, w.astype(jnp.bfloat16), b.reshape(1, N).astype(jnp.float32))


def conv1x1(x_nhwc, w, b, out_dtype=ACT_DTYPE):
    B, H, W, C = x_nhwc.shape
    y = matmul_bias(x_nhwc.reshape(B * H * W, C), w, b, out_dtype)
    return y.reshape(B, H, W, w.shape[1])


# ----------------------------------------------------------------------------
# depthwise 3x3 conv (+ folded BN + optional GELU), stride 1 and 2 variants
# ----------------------------------------------------------------------------
def _dwconv_s1_kernel(x_ref, w_ref, s_ref, t_ref, o_ref, xpad_sc, *, apply_gelu):
    # Stride-1: build the zero-padded image inside VMEM (no HBM jnp.pad round trip) and
    # read the 9 taps as static ref slices (review items: no jnp.pad, slice the ref).
    H, W, C = o_ref.shape[1], o_ref.shape[2], o_ref.shape[3]
    zr = jnp.zeros((1, W + 2, C), dtype=xpad_sc.dtype)
    zc = jnp.zeros((H + 2, 1, C), dtype=xpad_sc.dtype)
    xpad_sc[0:1, :, :] = zr
    xpad_sc[H + 1:H + 2, :, :] = zr
    xpad_sc[:, 0:1, :] = zc
    xpad_sc[:, W + 1:W + 2, :] = zc
    xpad_sc[1:H + 1, 1:W + 1, :] = x_ref[0]

    wv = w_ref[...].astype(jnp.float32)                     # (3, 3, C)
    # TODO(synk): bf16 taps with an f32 accumulator on v6e/v7x (VALU-bound kernel).
    acc = jnp.zeros((H, W, C), jnp.float32)
    for ki in range(3):
        for kj in range(3):
            tap = xpad_sc[ki:ki + H, kj:kj + W, :]
            acc = acc + tap.astype(jnp.float32) * wv[ki, kj, :]
    acc = acc * s_ref[0] + t_ref[0]
    if apply_gelu:
        acc = _gelu(acc)
    o_ref[0] = acc.astype(o_ref.dtype)


def _dwconv_s2_kernel(xee_ref, xeo_ref, xoe_ref, xoo_ref, w_ref, s_ref, t_ref, o_ref,
                      *, apply_gelu):
    # Stride-2 depthwise 3x3 from four parity views (each (1, Ho+1, Wo+1, C)):
    #   out[i,j] = sum_{ki,kj} w[ki,kj] * xpad[2i+ki, 2j+kj].
    Ho, Wo, C = o_ref.shape[1], o_ref.shape[2], o_ref.shape[3]
    xs = ((xee_ref, xeo_ref), (xoe_ref, xoo_ref))           # [row_parity][col_parity]
    wv = w_ref[...].astype(jnp.float32)
    acc = jnp.zeros((Ho, Wo, C), jnp.float32)
    for ki in range(3):
        for kj in range(3):
            src = xs[ki % 2][kj % 2]
            ri, cj = ki // 2, kj // 2
            tap = src[0, ri:ri + Ho, cj:cj + Wo, :]          # static ref slice
            acc = acc + tap.astype(jnp.float32) * wv[ki, kj, :]
    acc = acc * s_ref[0] + t_ref[0]
    if apply_gelu:
        acc = _gelu(acc)
    o_ref[0] = acc.astype(o_ref.dtype)


def _parity_view(x, rp, cp):
    """Zero-padded parity view: view[b, i, j] == xpad[b, 2i+rp, 2j+cp] (xpad = 1-px pad of x).

    Built directly from the unpadded input so the padded tensor never hits HBM.
    """
    sel = x[:, (1 - rp)::2, (1 - cp)::2, :]
    rpad = (1, 0) if rp == 0 else (0, 1)
    cpad = (1, 0) if cp == 0 else (0, 1)
    return jnp.pad(sel, ((0, 0), rpad, cpad, (0, 0)))


def dwconv3x3_bn_act(x_nhwc, w33c, bn_scale, bn_shift, stride, apply_gelu=True,
                     out_dtype=ACT_DTYPE):
    """Depthwise 3x3, padding=1, stride 1 or 2, fused with folded BN (+ optional GELU)."""
    # TODO(synk): tile over output rows with a 1-row halo (grid (B, H/tile_h)) for very large
    #             feature maps so the padded scratch stays within v7x's smaller VMEM.
    B, H, W, C = x_nhwc.shape
    s = bn_scale.reshape(1, C).astype(jnp.float32)
    t = bn_shift.reshape(1, C).astype(jnp.float32)
    params = pltpu.CompilerParams(dimension_semantics=("parallel",),
                                  vmem_limit_bytes=VMEM_LIMIT)
    if stride == 1:
        return pl.pallas_call(
            functools.partial(_dwconv_s1_kernel, apply_gelu=apply_gelu),
            grid=(B,),
            in_specs=[
                pl.BlockSpec((1, H, W, C), lambda b: (b, 0, 0, 0)),
                pl.BlockSpec((3, 3, C), lambda b: (0, 0, 0)),
                pl.BlockSpec((1, C), lambda b: (0, 0)),
                pl.BlockSpec((1, C), lambda b: (0, 0)),
            ],
            out_specs=pl.BlockSpec((1, H, W, C), lambda b: (b, 0, 0, 0)),
            out_shape=jax.ShapeDtypeStruct((B, H, W, C), out_dtype),
            scratch_shapes=[pltpu.VMEM((H + 2, W + 2, C), x_nhwc.dtype)],
            compiler_params=params,
        )(x_nhwc, w33c, s, t)

    # stride == 2: four parity views built straight from x (no padded intermediate in HBM).
    # TODO(synk): move the parity selection fully in-kernel via strided ref loads
    #             (pl.ds(..., stride=2)) to drop the remaining wrapper-side copy.
    Ho, Wo = H // 2, W // 2
    views = [_parity_view(x_nhwc, rp, cp) for rp in (0, 1) for cp in (0, 1)]
    par_spec = pl.BlockSpec((1, Ho + 1, Wo + 1, C), lambda b: (b, 0, 0, 0))
    return pl.pallas_call(
        functools.partial(_dwconv_s2_kernel, apply_gelu=apply_gelu),
        grid=(B,),
        in_specs=[par_spec, par_spec, par_spec, par_spec,
                  pl.BlockSpec((3, 3, C), lambda b: (0, 0, 0)),
                  pl.BlockSpec((1, C), lambda b: (0, 0)),
                  pl.BlockSpec((1, C), lambda b: (0, 0))],
        out_specs=pl.BlockSpec((1, Ho, Wo, C), lambda b: (b, 0, 0, 0)),
        out_shape=jax.ShapeDtypeStruct((B, Ho, Wo, C), out_dtype),
        compiler_params=params,
    )(*views, w33c, s, t)


# ----------------------------------------------------------------------------
# fused transformer block kernel:
#   LN1 -> qkv -> per-window relative self-attention (batched over packed windows)
#       -> proj -> residual add -> LN2 -> MLP (fc1/GELU/fc2) -> multiplicative combine
# ----------------------------------------------------------------------------
def _transformer_kernel(x_ref, g1_ref, b1_ref, wqkv_ref, bqkv_ref, wproj_ref, bproj_ref,
                        bias_ref, g2_ref, b2_ref, w1_ref, bf1_ref, w2_ref, bf2_ref,
                        o_ref, qkv_sc, attn_sc, *, num_heads, scale):
    wg, N, C = x_ref.shape
    dh = C // num_heads

    g1 = g1_ref[...]
    b1 = b1_ref[...]
    bqkv = bqkv_ref[...]

    # ---- LN1 + QKV projection (per window: full-contraction 2-D MXU matmuls) ----
    for w in range(wg):
        xw = x_ref[w].astype(jnp.float32)                            # (N, C)
        mu = jnp.mean(xw, axis=-1, keepdims=True)
        var = jnp.mean(jnp.square(xw - mu), axis=-1, keepdims=True)
        xn = (xw - mu) * jax.lax.rsqrt(var + 1e-5) * g1 + b1
        qkv = jnp.dot(xn.astype(jnp.bfloat16), wqkv_ref[...],
                      preferred_element_type=jnp.float32) + bqkv      # (N, 3C)
        qkv_sc[w] = qkv.astype(jnp.bfloat16)

    # ---- relative self-attention, per head, batched over the wg packed windows ----
    for h in range(num_heads):
        q = qkv_sc[:, :, h * dh:(h + 1) * dh]                         # (wg, N, dh) bf16
        k = qkv_sc[:, :, C + h * dh:C + (h + 1) * dh]
        v = qkv_sc[:, :, 2 * C + h * dh:2 * C + (h + 1) * dh]
        logits = jnp.einsum("wqd,wkd->wqk", q, k,
                            preferred_element_type=jnp.float32) * scale + bias_ref[h]
        m = jnp.max(logits, axis=-1, keepdims=True)
        pexp = jnp.exp(logits - m)
        attn = pexp * pl.reciprocal(jnp.sum(pexp, axis=-1, keepdims=True), approx=True)
        out_h = jnp.einsum("wqk,wkd->wqd", attn.astype(jnp.bfloat16), v,
                           preferred_element_type=jnp.float32)        # (wg, N, dh)
        attn_sc[:, :, h * dh:(h + 1) * dh] = out_h.astype(jnp.bfloat16)

    # ---- projection + residual + LN2 + MLP + multiplicative combine (per window) ----
    g2 = g2_ref[...]
    b2 = b2_ref[...]
    wproj = wproj_ref[...]
    bproj = bproj_ref[...]
    w1 = w1_ref[...]
    bf1 = bf1_ref[...]
    w2 = w2_ref[...]
    bf2 = bf2_ref[...]
    for w in range(wg):
        xw = x_ref[w].astype(jnp.float32)
        # head-concat @ Wproj as a single full-contraction (N, C)@(C, C) matmul
        y = xw + jnp.dot(attn_sc[w], wproj, preferred_element_type=jnp.float32) + bproj
        mu2 = jnp.mean(y, axis=-1, keepdims=True)
        var2 = jnp.mean(jnp.square(y - mu2), axis=-1, keepdims=True)
        yn = (y - mu2) * jax.lax.rsqrt(var2 + 1e-5) * g2 + b2
        h1 = _gelu(jnp.dot(yn.astype(jnp.bfloat16), w1,
                           preferred_element_type=jnp.float32) + bf1)
        mlp = jnp.dot(h1.astype(jnp.bfloat16), w2,
                      preferred_element_type=jnp.float32) + bf2
        o_ref[w] = (y * mlp).astype(o_ref.dtype)


def fused_transformer(tokens, p, rel_bias, wg, num_heads):
    """tokens: (P, N, C) packed windows -> (P, N, C); rel_bias: (num_heads, N, N)."""
    P, N, C = tokens.shape
    Hd = p["w_fc1"].shape[1]
    scale = float(num_heads) ** -0.5                        # matches RelativeSelfAttention
    c2 = lambda i: (0, 0)
    c3 = lambda i: (0, 0, 0)
    # TODO(synk): single-buffer the constant-index weight specs (pipeline_mode=pl.Buffered(1))
    #             to reclaim VMEM on v7x at large channel counts.
    return pl.pallas_call(
        functools.partial(_transformer_kernel, num_heads=num_heads, scale=scale),
        grid=(P // wg,),
        in_specs=[
            pl.BlockSpec((wg, N, C), lambda i: (i, 0, 0)),
            pl.BlockSpec((1, C), c2),                       # ln1 gamma
            pl.BlockSpec((1, C), c2),                       # ln1 beta
            pl.BlockSpec((C, 3 * C), c2),                   # w_qkv (bf16)
            pl.BlockSpec((1, 3 * C), c2),                   # b_qkv
            pl.BlockSpec((C, C), c2),                       # w_proj (bf16, pre-cast)
            pl.BlockSpec((1, C), c2),                       # b_proj
            pl.BlockSpec((num_heads, N, N), c3),            # relative positional bias
            pl.BlockSpec((1, C), c2),                       # ln2 gamma
            pl.BlockSpec((1, C), c2),                       # ln2 beta
            pl.BlockSpec((C, Hd), c2),                      # w_fc1 (bf16)
            pl.BlockSpec((1, Hd), c2),                      # b_fc1
            pl.BlockSpec((Hd, C), c2),                      # w_fc2 (bf16)
            pl.BlockSpec((1, C), c2),                       # b_fc2
        ],
        out_specs=pl.BlockSpec((wg, N, C), lambda i: (i, 0, 0)),
        out_shape=jax.ShapeDtypeStruct((P, N, C), ACT_DTYPE),
        scratch_shapes=[pltpu.VMEM((wg, N, 3 * C), jnp.bfloat16),
                        pltpu.VMEM((wg, N, C), jnp.bfloat16)],
        compiler_params=pltpu.CompilerParams(
            dimension_semantics=("parallel",), vmem_limit_bytes=VMEM_LIMIT),
    )(tokens,
      p["ln1_g"].reshape(1, C), p["ln1_b"].reshape(1, C),
      p["w_qkv"].astype(jnp.bfloat16), p["b_qkv"].reshape(1, 3 * C),
      p["w_proj"].astype(jnp.bfloat16), p["b_proj"].reshape(1, C),
      rel_bias,
      p["ln2_g"].reshape(1, C), p["ln2_b"].reshape(1, C),
      p["w_fc1"].astype(jnp.bfloat16), p["b_fc1"].reshape(1, Hd),
      p["w_fc2"].astype(jnp.bfloat16), p["b_fc2"].reshape(1, C))


# ----------------------------------------------------------------------------
# partition / reverse (NHWC, exact PyTorch permute semantics) and rel-pos index
# ----------------------------------------------------------------------------
def window_partition(x, ws):
    B, H, W, C = x.shape
    x = x.reshape(B, H // ws[0], ws[0], W // ws[1], ws[1], C)
    x = jnp.transpose(x, (0, 1, 3, 2, 4, 5))
    return x.reshape(-1, ws[0] * ws[1], C)


def window_reverse(windows, orig, ws):
    H, W = orig
    C = windows.shape[-1]
    B = windows.shape[0] // ((H // ws[0]) * (W // ws[1]))
    x = windows.reshape(B, H // ws[0], W // ws[1], ws[0], ws[1], C)
    x = jnp.transpose(x, (0, 1, 3, 2, 4, 5))
    return x.reshape(B, H, W, C)


def grid_partition(x, gs):
    B, H, W, C = x.shape
    x = x.reshape(B, gs[0], H // gs[0], gs[1], W // gs[1], C)
    x = jnp.transpose(x, (0, 2, 4, 1, 3, 5))
    return x.reshape(-1, gs[0] * gs[1], C)


def grid_reverse(grid, orig, gs):
    H, W = orig
    C = grid.shape[-1]
    B = grid.shape[0] // ((H // gs[0]) * (W // gs[1]))
    x = grid.reshape(B, H // gs[0], W // gs[1], gs[0], gs[1], C)
    x = jnp.transpose(x, (0, 3, 1, 4, 2, 5))
    return x.reshape(B, H, W, C)


def get_relative_position_index(win_h, win_w):
    coords = np.stack(np.meshgrid(np.arange(win_h), np.arange(win_w), indexing="ij"))
    coords_flat = coords.reshape(2, -1)
    rel = coords_flat[:, :, None] - coords_flat[:, None, :]
    rel = rel.transpose(1, 2, 0).astype(np.int64)
    rel[..., 0] += win_h - 1
    rel[..., 1] += win_w - 1
    rel[..., 0] *= 2 * win_w - 1
    return rel.sum(-1).astype(np.int32)


# ----------------------------------------------------------------------------
# module forward passes (NHWC bf16 activations; parameters are dicts of jnp arrays)
# ----------------------------------------------------------------------------
def mbconv_forward(x, p, downscale):
    eps = 1e-5
    stride = 2 if downscale else 1
    # fold BN0 (inference, running stats) into the pre 1x1 conv
    s0 = p["bn0_gamma"] * jax.lax.rsqrt(p["bn0_var"] + eps)
    t0 = p["bn0_beta"] - p["bn0_mean"] * s0
    w_pre = p["w_pre"] * s0[:, None]
    b_pre = p["b_pre"] + t0 @ p["w_pre"]
    y = conv1x1(x, w_pre, b_pre)
    ds_in = y
    # DepthwiseSeparableConv: dw3x3 -> BN -> GELU -> pw1x1 -> BN (no act)
    s1 = p["bn1_gamma"] * jax.lax.rsqrt(p["bn1_var"] + eps)
    t1 = p["bn1_beta"] - p["bn1_mean"] * s1
    y = dwconv3x3_bn_act(y, p["w_dw"], s1, t1, stride, apply_gelu=True)
    s2 = p["bn2_gamma"] * jax.lax.rsqrt(p["bn2_var"] + eps)
    t2 = p["bn2_beta"] - p["bn2_mean"] * s2
    y = conv1x1(y, p["w_pw"] * s2[None, :], t2)             # pointwise (no bias) + BN2 folded
    if (not downscale) and y.shape == ds_in.shape:
        y = y + ds_in                                       # internal residual (stride 1)
    # SqueezeExcite (tiny compute -> plain JAX, f32)
    se = jnp.mean(y.astype(jnp.float32), axis=(1, 2))
    se = jax.nn.relu(se @ p["w_se_red"] + p["b_se_red"])
    se = jax.nn.sigmoid(se @ p["w_se_exp"] + p["b_se_exp"])
    y = (y.astype(jnp.float32) * se[:, None, None, :]).astype(ACT_DTYPE)
    y = conv1x1(y, p["w_final"], p["b_final"])
    if downscale:
        B, H, W, C = x.shape
        skip = x.reshape(B, H // 2, 2, W // 2, 2, C).max(axis=(2, 4))   # MaxPool2d(2,2)
        skip = conv1x1(skip, p["w_skip"], p["b_skip"])
    else:
        skip = x
    return y + skip


def transformer_block_forward(x_nhwc, p, partition_fn, reverse_fn, gws, num_heads):
    # TODO(synk): gather 7x7 windows through the fused kernel's BlockSpec instead of the
    #             wrapper-side partition/reverse transposes (saves two HBM passes).
    B, H, W, C = x_nhwc.shape
    N = gws[0] * gws[1]
    part = partition_fn(x_nhwc, gws)                        # (P, N, C)
    P = part.shape[0]
    hidden = p["w_fc1"].shape[1]
    wg = _pick_window_group(P, N, C, hidden, num_heads)
    assert P % wg == 0, (P, wg)
    rel_bias = p["rel_table"][p["rel_index"].reshape(-1)].reshape(N, N, num_heads)
    rel_bias = jnp.transpose(rel_bias, (2, 0, 1)).astype(jnp.float32)   # (num_heads, N, N)
    out = fused_transformer(part, p, rel_bias, wg, num_heads)
    return reverse_fn(out, (H, W), gws)


def maxvit_stage_forward(x_nchw, blocks, num_heads, gws):
    x = jnp.transpose(x_nchw, (0, 2, 3, 1)).astype(ACT_DTYPE)   # NHWC + bf16 once
    for blk in blocks:
        x = mbconv_forward(x, blk["mbconv"], blk["downscale"])
        x = transformer_block_forward(x, blk["block_tr"], window_partition, window_reverse,
                                      gws, num_heads)
        x = transformer_block_forward(x, blk["grid_tr"], grid_partition, grid_reverse,
                                      gws, num_heads)
    return jnp.transpose(x, (0, 3, 1, 2)).astype(jnp.float32)   # back to NCHW (module I/O)


# ----------------------------------------------------------------------------
# deterministic parameter initialization
# ----------------------------------------------------------------------------
class KeyGen:
    def __init__(self, key):
        self.key = key

    def __call__(self):
        self.key, sub = jax.random.split(self.key)
        return sub


def _make_divisible(v, divisor=8, min_value=None):
    min_value = min_value or divisor
    new_v = max(min_value, int(v + divisor / 2) // divisor * divisor)
    if new_v < 0.9 * v:
        new_v += divisor
    return new_v


def _n(kg, shape, std=0.1):
    return std * jax.random.normal(kg(), shape, dtype=jnp.float32)


def init_mbconv(kg, cin, cout, downscale):
    rd = _make_divisible(cout * 0.25)
    p = dict(
        bn0_gamma=1.0 + _n(kg, (cin,), 0.05), bn0_beta=_n(kg, (cin,), 0.05),
        bn0_mean=jnp.zeros((cin,), jnp.float32), bn0_var=jnp.ones((cin,), jnp.float32),
        w_pre=_n(kg, (cin, cin)), b_pre=_n(kg, (cin,), 0.02),
        w_dw=_n(kg, (3, 3, cin)),
        bn1_gamma=1.0 + _n(kg, (cin,), 0.05), bn1_beta=_n(kg, (cin,), 0.05),
        bn1_mean=jnp.zeros((cin,), jnp.float32), bn1_var=jnp.ones((cin,), jnp.float32),
        w_pw=_n(kg, (cin, cout)),
        bn2_gamma=1.0 + _n(kg, (cout,), 0.05), bn2_beta=_n(kg, (cout,), 0.05),
        bn2_mean=jnp.zeros((cout,), jnp.float32), bn2_var=jnp.ones((cout,), jnp.float32),
        w_se_red=_n(kg, (cout, rd)), b_se_red=jnp.zeros((rd,), jnp.float32),
        w_se_exp=_n(kg, (rd, cout)), b_se_exp=jnp.zeros((cout,), jnp.float32),
        w_final=_n(kg, (cout, cout)), b_final=_n(kg, (cout,), 0.02),
    )
    if downscale:
        p["w_skip"] = _n(kg, (cin, cout))
        p["b_skip"] = _n(kg, (cout,), 0.02)
    return p


def init_transformer(kg, c, num_heads, gws, mlp_ratio=4.0):
    hidden = int(mlp_ratio * c)
    return dict(
        ln1_g=1.0 + _n(kg, (c,), 0.05), ln1_b=_n(kg, (c,), 0.05),
        w_qkv=_n(kg, (c, 3 * c)), b_qkv=_n(kg, (3 * c,), 0.02),
        w_proj=_n(kg, (c, c)), b_proj=_n(kg, (c,), 0.02),
        rel_table=_n(kg, ((2 * gws[0] - 1) * (2 * gws[1] - 1), num_heads), 0.02),
        rel_index=jnp.asarray(get_relative_position_index(gws[0], gws[1])),
        ln2_g=1.0 + _n(kg, (c,), 0.05), ln2_b=_n(kg, (c,), 0.05),
        w_fc1=_n(kg, (c, hidden)), b_fc1=_n(kg, (hidden,), 0.02),
        w_fc2=_n(kg, (hidden, c)), b_fc2=_n(kg, (c,), 0.02),
    )


def init_maxvit_stage(kg, depth, in_channels, out_channels, num_heads, gws, mlp_ratio=4.0):
    blocks = []
    for index in range(depth):
        cin = in_channels if index == 0 else out_channels
        downscale = index == 0
        blocks.append(dict(
            downscale=downscale,
            mbconv=init_mbconv(kg, cin, out_channels, downscale),
            block_tr=init_transformer(kg, out_channels, num_heads, gws, mlp_ratio),
            grid_tr=init_transformer(kg, out_channels, num_heads, gws, mlp_ratio),
        ))
    return blocks


# ----------------------------------------------------------------------------
if __name__ == "__main__":
    depth = 1
    in_channels, out_channels = 4, 8
    num_heads = 2                       # must divide out_channels
    grid_window_size = (7, 7)
    B, H, W = 2, 28, 28                 # after downscale: 14x14, divisible by 7

    assert out_channels % num_heads == 0

    kg = KeyGen(jax.random.PRNGKey(0))
    params = init_maxvit_stage(kg, depth, in_channels, out_channels, num_heads,
                               grid_window_size)
    x = jax.random.normal(jax.random.PRNGKey(0), (B, in_channels, H, W), dtype=jnp.float32)

    out = maxvit_stage_forward(x, params, num_heads, grid_window_size)
    out = jax.block_until_ready(out)

    assert out.shape == (B, out_channels, H // 2, W // 2), out.shape
    assert bool(jnp.all(jnp.isfinite(out)))
    print("KERNEL_OK")
</pallas_src>

<mosaic_0001>
module attributes {stable_mosaic.version = 11 : i64} {
  func.func @_matmul_bias_kernel(%arg0: i32, %arg1: i32, %arg2: i32, %arg3: memref<784x4xbf16, #tpu.memory_space<vmem>>, %arg4: memref<4x4xbf16, #tpu.memory_space<vmem>>, %arg5: memref<1x4xf32, #tpu.memory_space<vmem>>, %arg6: memref<784x4xbf16, #tpu.memory_space<vmem>>, %arg7: memref<784x4xf32, #tpu.memory_space<vmem>>) attributes {dimension_semantics = [#tpu.dimension_semantics<parallel>, #tpu.dimension_semantics<parallel>, #tpu.dimension_semantics<arbitrary>], iteration_bounds = array<i64: 2, 1, 1>, scalar_prefetch = 0 : i64, scratch_operands = 1 : i64, tpu.core_type = #tpu.core_type<tc>, window_params = [{transform_indices = @transform_0, window_bounds = array<i64: 784, 4>}, {transform_indices = @transform_1, window_bounds = array<i64: 4, 4>}, {transform_indices = @transform_2, window_bounds = array<i64: 1, 4>}, {transform_indices = @transform_3, window_bounds = array<i64: 784, 4>}]} {
    %c0_i32 = arith.constant 0 : i32
    %0 = arith.cmpi eq, %arg2, %c0_i32 : i32
    %1 = arith.extui %0 : i1 to i32
    %c0_i32_0 = arith.constant 0 : i32
    %2 = arith.cmpi ne, %1, %c0_i32_0 : i32
    scf.if %2 {
      %cst_10 = arith.constant 0.000000e+00 : f32
      %12 = vector.broadcast %cst_10 : f32 to vector<784x4xf32>
      %c0_11 = arith.constant 0 : index
      %c0_12 = arith.constant 0 : index
      %13 = vector.load %arg7[%c0_11, %c0_12] : memref<784x4xf32, #tpu.memory_space<vmem>>, vector<784x4xf32>
      tpu.vector_store %arg7[%c0_11, %c0_12], %12 {strides = array<i32>} : memref<784x4xf32, #tpu.memory_space<vmem>>, vector<784x4xf32>,
    } else {
    }
    %c0 = arith.constant 0 : index
    %c0_1 = arith.constant 0 : index
    %3 = vector.load %arg7[%c0, %c0_1] : memref<784x4xf32, #tpu.memory_space<vmem>>, vector<784x4xf32>
    %c0_2 = arith.constant 0 : index
    %c0_3 = arith.constant 0 : index
    %4 = vector.load %arg3[%c0_2, %c0_3] : memref<784x4xbf16, #tpu.memory_space<vmem>>, vector<784x4xbf16>
    %c0_4 = arith.constant 0 : index
    %c0_5 = arith.constant 0 : index
    %5 = vector.load %arg4[%c0_4, %c0_5] : memref<4x4xbf16, #tpu.memory_space<vmem>>, vector<4x4xbf16>
    %cst = arith.constant dense<0.000000e+00> : vector<784x4xf32>
    %6 = tpu.matmul %4, %5, %cst {dimension_numbers = #tpu.dot_dimension_numbers<[1], [0], [0], [1], [0, 0, 1, 1], [], []>} : vector<784x4xbf16>, vector<4x4xbf16>, vector<784x4xf32> -> vector<784x4xf32>
    %7 = arith.addf %3, %6 : vector<784x4xf32>
    %c0_6 = arith.constant 0 : index
    %c0_7 = arith.constant 0 : index
    %8 = vector.load %arg7[%c0_6, %c0_7] : memref<784x4xf32, #tpu.memory_space<vmem>>, vector<784x4xf32>
    tpu.vector_store %arg7[%c0_6, %c0_7], %7 {strides = array<i32>} : memref<784x4xf32, #tpu.memory_space<vmem>>, vector<784x4xf32>,
    %c0_i32_8 = arith.constant 0 : i32
    %9 = arith.cmpi eq, %arg2, %c0_i32_8 : i32
    %10 = arith.extui %9 : i1 to i32
    %c0_i32_9 = arith.constant 0 : i32
    %11 = arith.cmpi ne, %10, %c0_i32_9 : i32
    scf.if %11 {
      %c0_10 = arith.constant 0 : index
      %c0_11 = arith.constant 0 : index
      %12 = vector.load %arg7[%c0_10, %c0_11] : memref<784x4xf32, #tpu.memory_space<vmem>>, vector<784x4xf32>
      %c0_12 = arith.constant 0 : index
      %c0_13 = arith.constant 0 : index
      %13 = vector.load %arg5[%c0_12, %c0_13] : memref<1x4xf32, #tpu.memory_space<vmem>>, vector<1x4xf32>
      %14 = vector.broadcast %13 : vector<1x4xf32> to vector<784x4xf32>
      %15 = arith.addf %12, %14 : vector<784x4xf32>
      %16 = arith.truncf %15 : vector<784x4xf32> to vector<784x4xbf16>
      %c0_14 = arith.constant 0 : index
      %c0_15 = arith.constant 0 : index
      %17 = vector.load %arg6[%c0_14, %c0_15] : memref<784x4xbf16, #tpu.memory_space<vmem>>, vector<784x4xbf16>
      tpu.vector_store %arg6[%c0_14, %c0_15], %16 {strides = array<i32>} : memref<784x4xbf16, #tpu.memory_space<vmem>>, vector<784x4xbf16>,
    } else {
    }
    return
  }
  func.func @transform_0(%arg0: i32, %arg1: i32, %arg2: i32) -> (i32, i32) {
    %c0_i32 = arith.constant 0 : i32
    return %arg0, %arg2 : i32, i32
  }
  func.func @transform_1(%arg0: i32, %arg1: i32, %arg2: i32) -> (i32, i32) {
    %c0_i32 = arith.constant 0 : i32
    return %arg2, %arg1 : i32, i32
  }
  func.func @transform_2(%arg0: i32, %arg1: i32, %arg2: i32) -> (i32, i32) {
    %c0_i32 = arith.constant 0 : i32
    %c0_i32_0 = arith.constant 0 : i32
    return %c0_i32, %arg1 : i32, i32
  }
  func.func @transform_3(%arg0: i32, %arg1: i32, %arg2: i32) -> (i32, i32) {
    %c0_i32 = arith.constant 0 : i32
    return %arg0, %arg1 : i32, i32
  }
}

</mosaic_0001>

<bundles_post_ra>
// kernel: tpu_custom_call.1
= control target key start
LH: loop header
LB: loop body
LE: loop exit
PB: predicated region body
PF: predicated region fallthrough
CT: control target
= control target key end

     0   :  { %s3059_s12 = smov 0   ;;  %s3061_s13 = smov 0   ;;  %s3919_s0 = inlined_call_operand.vmem [shape: bf16[1568,4], index: 0, kind: input, shape index: {}]   ;;  %s3920_s1 = inlined_call_operand.vmem [shape: bf16[4,4], index: 1, kind: input, shape index: {}]   ;;  %s3921_s2 = inlined_call_operand.vmem [shape: f32[1,4], index: 2, kind: input, shape index: {}]   ;;  %s3922_s3 = inlined_call_operand.vmem [shape: bf16[1568,4], index: 3, kind: output, shape index: {}]  }
   0x1   :  { %s3063_s14 = smov 0  }
   0x2 LB: > { %s32_s15 = sadd.s32 1, %s3031_s13  ;;  %p2387_p0 = scmp.ge.s32.totalorder %s3035_s14, 1  ;;  %s3035_s14 = sphi %s3063_s14, %s13_s14   ;;  %s3031_s13 = sphi %s3061_s13, %s3925_s13   ;;  %s3027_s12 = sphi %s3059_s12, %s3924_s12  }
   0x3   : > { %p34_p1 = scmp.ge.s32.totalorder %s32_s15, 2  ;;  %p186_p2 = scmp.lt.s32.totalorder %s3035_s14, 3 }
   0x5   : > { %s3927_s15 = smov (%p34_p1, %s32_s15), 0  ;;  %p187_p3 = pnand %p2387_p0, %p186_p2 }
   0x6   : > { %v554_v0 = vld [vmem:[%s3920_s1] sm:$0x3] (!%p187_p3)  ;;  %vm948_vm0 = vcmask (!%p187_p3), 1041408   ;;  %s226_s18 = smul.u32 (!%p187_p3), 98, %s3027_s12  ;;  %v3037_v1 = vmov (!%p187_p3), 0.0   ;;  %vm3038_vm1 = vmmov (!%p187_p3), 0  }
   0x7   : > { %190 = sbr.rel (%p187_p3) target bundleno = 439 (0x1b7), region = 32  ;;  %2737 = vmatprep.subr.bf16.mxu0 (!%p187_p3), %v3037_v1  ;;  %v3084_v2 = vsel (!%p187_p3), %vm948_vm0, %v554_v0, 0  ;;  %2739 = vmatprep.mubr.msk.bf16.mxu0 (!%p187_p3), %vm3038_vm1, %v3037_v1  ;;  %vm259_vm2 = vcmask (!%p187_p3), 31744   ;;  %vm2171_vm3 = vcmask (!%p187_p3), 27648  }
   0x8   : > { %2738 = vmatpush3.bf16.msra.mxu0 (!%p187_p3), %v3084_v2  ;;  %p3091_p4 = scmp.lt.s32.totalorder (!%p187_p3), %s226_s18, 195  ;;  %260 = vst.msk [vmem:[#allocation2] sm:$0xff] (!%p187_p3), %vm259_vm2, %v3037_v1  ;;  %261 = vst.msk [vmem:[#allocation2 + $0x8] sm:$0xff] (!%p187_p3), %vm259_vm2, %v3037_v1  ;;  %2935 = vmatprep.subr.bf16.mxu1 (!%p187_p3), %v3037_v1 }
   0x9   : > { %262 = vst.msk [vmem:[#allocation2 + $0x10] sm:$0xff] (!%p187_p3), %vm259_vm2, %v3037_v1  ;;  %263 = vst.msk [vmem:[#allocation2 + $0x18] sm:$0xff] (!%p187_p3), %vm259_vm2, %v3037_v1  ;;  %2936 = vmatpush3.bf16.msra.mxu1 (!%p187_p3), %v3084_v2  ;;  %2839 = vmatprep.mubr.msk.bf16.mxu1 (!%p187_p3), %vm3038_vm1, %v3037_v1 }
   0xa   : > { %264 = vst.msk [vmem:[#allocation2 + $0x20] sm:$0xff] (!%p187_p3), %vm259_vm2, %v3037_v1  ;;  %265 = vst.msk [vmem:[#allocation2 + $0x28] sm:$0xff] (!%p187_p3), %vm259_vm2, %v3037_v1 }
   0xb   : > { %266 = vst.msk [vmem:[#allocation2 + $0x30] sm:$0xff] (!%p187_p3), %vm259_vm2, %v3037_v1  ;;  %267 = vst.msk [vmem:[#allocation2 + $0x38] sm:$0xff] (!%p187_p3), %vm259_vm2, %v3037_v1 }
   0xc   : > { %268 = vst.msk [vmem:[#allocation2 + $0x40] sm:$0xff] (!%p187_p3), %vm259_vm2, %v3037_v1  ;;  %269 = vst.msk [vmem:[#allocation2 + $0x48] sm:$0xff] (!%p187_p3), %vm259_vm2, %v3037_v1 }
   0xd   : > { %270 = vst.msk [vmem:[#allocation2 + $0x50] sm:$0xff] (!%p187_p3), %vm259_vm2, %v3037_v1  ;;  %271 = vst.msk [vmem:[#allocation2 + $0x58] sm:$0xff] (!%p187_p3), %vm259_vm2, %v3037_v1 }
   0xe   : > { %272 = vst.msk [vmem:[#allocation2 + $0x60] sm:$0xff] %vm259_vm2, %v3037_v1  ;;  %273 = vst.msk [vmem:[#allocation2 + $0x68] sm:$0xff] %vm259_vm2, %v3037_v1  ;;  %s3929_s18 = smov (!%p3091_p4, %s226_s18), 195 }
   0xf   : > { %274 = vst.msk [vmem:[#allocation2 + $0x70] sm:$0xff] %vm259_vm2, %v3037_v1  ;;  %275 = vst.msk [vmem:[#allocation2 + $0x78] sm:$0xff] %vm259_vm2, %v3037_v1  ;;  %s2388_s20 = sshll.u32 %s3929_s18, 2  ;;  %v358_v52 = vld [vmem:[#allocation2] sm:$0xff]  ;;  %v359_v55 = vld [vmem:[#allocation2 + $0x8] sm:$0xff] }
  0x10   : > { %276 = vst.msk [vmem:[#allocation2 + $0x80] sm:$0xff] %vm259_vm2, %v3037_v1  ;;  %277 = vst.msk [vmem:[#allocation2 + $0x88] sm:$0xff] %vm259_vm2, %v3037_v1  ;;  %s3307_s23 = scalar_lea.vmem %s3919_s0, %s2388_s20  ;;  %s3517_s28 = scalar_lea.vmem %s3922_s3, %s2388_s20 }
  0x11   : > { %278 = vst.msk [vmem:[#allocation2 + $0x90] sm:$0xff] %vm259_vm2, %v3037_v1  ;;  %279 = vst.msk [vmem:[#allocation2 + $0x98] sm:$0xff] %vm259_vm2, %v3037_v1  ;;  %v2963_v3 = vld [vmem:[%s3307_s23] sm:$0xff]   ;;  %v2964_v4 = vld [vmem:[%s3307_s23 + $0xc8] sm:$0xff]  }
  0x12   : > { %280 = vst.msk [vmem:[#allocation2 + $0xa0] sm:$0xff] %vm259_vm2, %v3037_v1  ;;  %281 = vst.msk [vmem:[#allocation2 + $0xa8] sm:$0xff] %vm259_vm2, %v3037_v1  ;;  %2740 = vmatmul.mubr.msk.bf16.vlgmr.msra.gmra.mrb[0].mxu0 %vm259_vm2, %v2963_v3  ;;  %2840 = vmatmul.mubr.msk.bf16.vlgmr.msra.gmra.mrb[0].mxu1 %vm259_vm2, %v2964_v4  ;;  %v2965_v5 = vld [vmem:[%s3307_s23 + $0x8] sm:$0xff]   ;;  %v2966_v6 = vld [vmem:[%s3307_s23 + $0xd0] sm:$0xff]  }
  0x13   : > { %282 = vst.msk [vmem:[#allocation2 + $0xb0] sm:$0xff] %vm259_vm2, %v3037_v1  ;;  %283 = vst.msk [vmem:[#allocation2 + $0xb8] sm:$0xff] %vm259_vm2, %v3037_v1  ;;  %2743 = vmatprep.mubr.msk.bf16.mxu0 %vm3038_vm1, %v3037_v1  ;;  %2843 = vmatprep.mubr.msk.bf16.mxu1 %vm3038_vm1, %v3037_v1  ;;  %v2967_v7 = vld [vmem:[%s3307_s23 + $0x10] sm:$0xff]   ;;  %v2968_v8 = vld [vmem:[%s3307_s23 + $0xd8] sm:$0xff]  }
  0x14   : > { %284 = vst.msk [vmem:[#allocation2 + $0xc0] sm:$0xff] %vm259_vm2, %v3037_v1  ;;  %285 = vst.msk [vmem:[#allocation2 + $0xc8] sm:$0xff] %vm259_vm2, %v3037_v1  ;;  %v2969_v9 = vld [vmem:[%s3307_s23 + $0x18] sm:$0xff]   ;;  %v2970_v10 = vld [vmem:[%s3307_s23 + $0xe0] sm:$0xff]  }
  0x15   : > { %286 = vst.msk [vmem:[#allocation2 + $0xd0] sm:$0xff] %vm259_vm2, %v3037_v1  ;;  %287 = vst.msk [vmem:[#allocation2 + $0xd8] sm:$0xff] %vm259_vm2, %v3037_v1  ;;  %v2971_v11 = vld [vmem:[%s3307_s23 + $0x20] sm:$0xff]   ;;  %v2972_v12 = vld [vmem:[%s3307_s23 + $0xe8] sm:$0xff]  }
  0x16   : > { %288 = vst.msk [vmem:[#allocation2 + $0xe0] sm:$0xff] %vm259_vm2, %v3037_v1  ;;  %289 = vst.msk [vmem:[#allocation2 + $0xe8] sm:$0xff] %vm259_vm2, %v3037_v1  ;;  %v2973_v13 = vld [vmem:[%s3307_s23 + $0x28] sm:$0xff]   ;;  %v2974_v14 = vld [vmem:[%s3307_s23 + $0xf0] sm:$0xff]  }
  0x17   : > { %290 = vst.msk [vmem:[#allocation2 + $0xf0] sm:$0xff] %vm259_vm2, %v3037_v1  ;;  %291 = vst.msk [vmem:[#allocation2 + $0xf8] sm:$0xff] %vm259_vm2, %v3037_v1  ;;  %v2975_v15 = vld [vmem:[%s3307_s23 + $0x30] sm:$0xff]   ;;  %v2976_v16 = vld [vmem:[%s3307_s23 + $0xf8] sm:$0xff]  }
  0x18   : > { %292 = vst.msk [vmem:[#allocation2 + $0x100] sm:$0xff] %vm259_vm2, %v3037_v1  ;;  %293 = vst.msk [vmem:[#allocation2 + $0x108] sm:$0xff] %vm259_vm2, %v3037_v1  ;;  %v2977_v17 = vld [vmem:[%s3307_s23 + $0x38] sm:$0xff]   ;;  %v2978_v18 = vld [vmem:[%s3307_s23 + $0x100] sm:$0xff]  }
  0x19   : > { %294 = vst.msk [vmem:[#allocation2 + $0x110] sm:$0xff] %vm259_vm2, %v3037_v1  ;;  %295 = vst.msk [vmem:[#allocation2 + $0x118] sm:$0xff] %vm259_vm2, %v3037_v1  ;;  %v2979_v19 = vld [vmem:[%s3307_s23 + $0x40] sm:$0xff]   ;;  %v2980_v20 = vld [vmem:[%s3307_s23 + $0x108] sm:$0xff]  }
  0x1a   : > { %296 = vst.msk [vmem:[#allocation2 + $0x120] sm:$0xff] %vm259_vm2, %v3037_v1  ;;  %297 = vst.msk [vmem:[#allocation2 + $0x128] sm:$0xff] %vm259_vm2, %v3037_v1  ;;  %2744 = vmatmul.mubr.msk.bf16.gmra.mrb[4].mxu0 %vm259_vm2, %v2965_v5  ;;  %2844 = vmatmul.mubr.msk.bf16.gmra.mrb[4].mxu1 %vm259_vm2, %v2966_v6  ;;  %v2981_v21 = vld [vmem:[%s3307_s23 + $0x48] sm:$0xff]   ;;  %v2982_v22 = vld [vmem:[%s3307_s23 + $0x110] sm:$0xff]  }
  0x1b   : > { %298 = vst.msk [vmem:[#allocation2 + $0x130] sm:$0xff] %vm259_vm2, %v3037_v1  ;;  %299 = vst.msk [vmem:[#allocation2 + $0x138] sm:$0xff] %vm259_vm2, %v3037_v1  ;;  %2747 = vmatprep.mubr.msk.bf16.mxu0 %vm3038_vm1, %v3037_v1  ;;  %2847 = vmatprep.mubr.msk.bf16.mxu1 %vm3038_vm1, %v3037_v1  ;;  %v2983_v23 = vld [vmem:[%s3307_s23 + $0x50] sm:$0xff]   ;;  %v2984_v24 = vld [vmem:[%s3307_s23 + $0x118] sm:$0xff]  }
  0x1c   : > { %300 = vst.msk [vmem:[#allocation2 + $0x140] sm:$0xff] %vm259_vm2, %v3037_v1  ;;  %301 = vst.msk [vmem:[#allocation2 + $0x148] sm:$0xff] %vm259_vm2, %v3037_v1  ;;  %v2985_v25 = vld [vmem:[%s3307_s23 + $0x58] sm:$0xff]   ;;  %v2986_v26 = vld [vmem:[%s3307_s23 + $0x120] sm:$0xff]  }
  0x1d   : > { %302 = vst.msk [vmem:[#allocation2 + $0x150] sm:$0xff] %vm259_vm2, %v3037_v1  ;;  %303 = vst.msk [vmem:[#allocation2 + $0x158] sm:$0xff] %vm259_vm2, %v3037_v1  ;;  %v2987_v27 = vld [vmem:[%s3307_s23 + $0x60] sm:$0xff]   ;;  %v2988_v28 = vld [vmem:[%s3307_s23 + $0x128] sm:$0xff]  }
  0x1e   : > { %304 = vst.msk [vmem:[#allocation2 + $0x160] sm:$0xff] %vm259_vm2, %v3037_v1  ;;  %305 = vst.msk [vmem:[#allocation2 + $0x168] sm:$0xff] %vm259_vm2, %v3037_v1  ;;  %v2989_v29 = vld [vmem:[%s3307_s23 + $0x68] sm:$0xff]   ;;  %v2990_v30 = vld [vmem:[%s3307_s23 + $0x130] sm:$0xff]  }
  0x1f   : > { %306 = vst.msk [vmem:[#allocation2 + $0x170] sm:$0xff] %vm259_vm2, %v3037_v1  ;;  %307 = vst.msk [vmem:[#allocation2 + $0x178] sm:$0xff] %vm259_vm2, %v3037_v1  ;;  %v2991_v31 = vld [vmem:[%s3307_s23 + $0x70] sm:$0xff]   ;;  %v2992_v32 = vld [vmem:[%s3307_s23 + $0x138] sm:$0xff]  }
  0x20   : > { %308 = vst.msk [vmem:[#allocation2 + $0x180] sm:$0xff] %vm259_vm2, %v3037_v1  ;;  %309 = vst.msk [vmem:[#allocation2 + $0x188] sm:$0xff] %vm259_vm2, %v3037_v1  ;;  %v2993_v33 = vld [vmem:[%s3307_s23 + $0x78] sm:$0xff]   ;;  %v2994_v34 = vld [vmem:[%s3307_s23 + $0x140] sm:$0xff]  }
  0x21   : > { %310 = vst.msk [vmem:[#allocation2 + $0x190] sm:$0xff] %vm259_vm2, %v3037_v1  ;;  %311 = vst.msk [vmem:[#allocation2 + $0x198] sm:$0xff] %vm259_vm2, %v3037_v1  ;;  %v2995_v35 = vld [vmem:[%s3307_s23 + $0x80] sm:$0xff]   ;;  %v2996_v36 = vld [vmem:[%s3307_s23 + $0x148] sm:$0xff]  }
  0x22   : > { %312 = vst.msk [vmem:[#allocation2 + $0x1a0] sm:$0xff] %vm259_vm2, %v3037_v1  ;;  %313 = vst.msk [vmem:[#allocation2 + $0x1a8] sm:$0xff] %vm259_vm2, %v3037_v1  ;;  %2748 = vmatmul.mubr.msk.bf16.gmra.mrb[8].mxu0 %vm259_vm2, %v2967_v7  ;;  %2848 = vmatmul.mubr.msk.bf16.gmra.mrb[8].mxu1 %vm259_vm2, %v2968_v8  ;;  %v2997_v37 = vld [vmem:[%s3307_s23 + $0x88] sm:$0xff]   ;;  %v2998_v38 = vld [vmem:[%s3307_s23 + $0x150] sm:$0xff]  }
  0x23   : > { %314 = vst.msk [vmem:[#allocation2 + $0x1b0] sm:$0xff] %vm259_vm2, %v3037_v1  ;;  %315 = vst.msk [vmem:[#allocation2 + $0x1b8] sm:$0xff] %vm259_vm2, %v3037_v1  ;;  %2751 = vmatprep.mubr.msk.bf16.mxu0 %vm3038_vm1, %v3037_v1  ;;  %2851 = vmatprep.mubr.msk.bf16.mxu1 %vm3038_vm1, %v3037_v1  ;;  %v2999_v39 = vld [vmem:[%s3307_s23 + $0x90] sm:$0xff]   ;;  %v3000_v40 = vld [vmem:[%s3307_s23 + $0x158] sm:$0xff]  }
  0x24   : > { %316 = vst.msk [vmem:[#allocation2 + $0x1c0] sm:$0xff] %vm259_vm2, %v3037_v1  ;;  %317 = vst.msk [vmem:[#allocation2 + $0x1c8] sm:$0xff] %vm259_vm2, %v3037_v1  ;;  %v3001_v41 = vld [vmem:[%s3307_s23 + $0x98] sm:$0xff]   ;;  %v3002_v42 = vld [vmem:[%s3307_s23 + $0x160] sm:$0xff]  }
  0x25   : > { %318 = vst.msk [vmem:[#allocation2 + $0x1d0] sm:$0xff] %vm259_vm2, %v3037_v1  ;;  %319 = vst.msk [vmem:[#allocation2 + $0x1d8] sm:$0xff] %vm259_vm2, %v3037_v1  ;;  %v3003_v43 = vld [vmem:[%s3307_s23 + $0xa0] sm:$0xff]   ;;  %v3004_v44 = vld [vmem:[%s3307_s23 + $0x168] sm:$0xff]  }
  0x26   : > { %320 = vst.msk [vmem:[#allocation2 + $0x1e0] sm:$0xff] %vm259_vm2, %v3037_v1  ;;  %321 = vst.msk [vmem:[#allocation2 + $0x1e8] sm:$0xff] %vm259_vm2, %v3037_v1  ;;  %v3005_v45 = vld [vmem:[%s3307_s23 + $0xa8] sm:$0xff]   ;;  %v3006_v46 = vld [vmem:[%s3307_s23 + $0x170] sm:$0xff]  }
  0x27   : > { %322 = vst.msk [vmem:[#allocation2 + $0x1f0] sm:$0xff] %vm259_vm2, %v3037_v1  ;;  %323 = vst.msk [vmem:[#allocation2 + $0x1f8] sm:$0xff] %vm259_vm2, %v3037_v1  ;;  %v3007_v47 = vld [vmem:[%s3307_s23 + $0xb0] sm:$0xff]   ;;  %v3008_v48 = vld [vmem:[%s3307_s23 + $0x178] sm:$0xff]  }
  0x28   : > { %324 = vst.msk [vmem:[#allocation2 + $0x200] sm:$0xff] %vm259_vm2, %v3037_v1  ;;  %325 = vst.msk [vmem:[#allocation2 + $0x208] sm:$0xff] %vm259_vm2, %v3037_v1  ;;  %v3009_v49 = vld [vmem:[%s3307_s23 + $0xb8] sm:$0xff]   ;;  %v3010_v50 = vld [vmem:[%s3307_s23 + $0x180] sm:$0xff]  }
  0x29   : > { %326 = vst.msk [vmem:[#allocation2 + $0x210] sm:$0xff] %vm259_vm2, %v3037_v1  ;;  %327 = vst.msk [vmem:[#allocation2 + $0x218] sm:$0xff] %vm259_vm2, %v3037_v1  ;;  %v3011_v51 = vld [vmem:[%s3307_s23 + $0xc0] sm:$0xff]   ;;  %v408_v53 = vld [vmem:[#allocation2 + $0x190] sm:$0xff] }
  0x2a   : > { %328 = vst.msk [vmem:[#allocation2 + $0x220] sm:$0xff] %vm259_vm2, %v3037_v1  ;;  %329 = vst.msk [vmem:[#allocation2 + $0x228] sm:$0xff] %vm259_vm2, %v3037_v1  ;;  %2752 = vmatmul.mubr.msk.bf16.gmra.mrb[12].mxu0 %vm259_vm2, %v2969_v9  ;;  %2852 = vmatmul.mubr.msk.bf16.gmra.mrb[12].mxu1 %vm259_vm2, %v2970_v10  ;;  %v409_v59 = vld [vmem:[#allocation2 + $0x198] sm:$0xff]  ;;  %v360_v4 = vld [vmem:[#allocation2 + $0x10] sm:$0xff] }
  0x2b   : > { %330 = vst.msk [vmem:[#allocation2 + $0x230] sm:$0xff] %vm259_vm2, %v3037_v1  ;;  %331 = vst.msk [vmem:[#allocation2 + $0x238] sm:$0xff] %vm259_vm2, %v3037_v1  ;;  %2755 = vmatprep.mubr.msk.bf16.mxu0 %vm3038_vm1, %v3037_v1  ;;  %2855 = vmatprep.mubr.msk.bf16.mxu1 %vm3038_vm1, %v3037_v1  ;;  %v410_v5 = vld [vmem:[#allocation2 + $0x1a0] sm:$0xff]  ;;  %v361_v8 = vld [vmem:[#allocation2 + $0x18] sm:$0xff] }
  0x2c   : > { %332 = vst.msk [vmem:[#allocation2 + $0x240] sm:$0xff] %vm259_vm2, %v3037_v1  ;;  %333 = vst.msk [vmem:[#allocation2 + $0x248] sm:$0xff] %vm259_vm2, %v3037_v1  ;;  %v3508_v6 = vld [vmem:[%s3921_s2] ss:$0 sm:$0xff] }
  0x2d   : > { %334 = vst.msk [vmem:[#allocation2 + $0x250] sm:$0xff] %vm259_vm2, %v3037_v1  ;;  %335 = vst.msk [vmem:[#allocation2 + $0x258] sm:$0xff] %vm259_vm2, %v3037_v1 }
  0x2e   : > { %336 = vst.msk [vmem:[#allocation2 + $0x260] sm:$0xff] %vm259_vm2, %v3037_v1  ;;  %337 = vst.msk [vmem:[#allocation2 + $0x268] sm:$0xff] %vm259_vm2, %v3037_v1 }
  0x2f   : > { %338 = vst.msk [vmem:[#allocation2 + $0x270] sm:$0xff] %vm259_vm2, %v3037_v1  ;;  %339 = vst.msk [vmem:[#allocation2 + $0x278] sm:$0xff] %vm259_vm2, %v3037_v1 }
  0x30   : > { %340 = vst.msk [vmem:[#allocation2 + $0x280] sm:$0xff] %vm259_vm2, %v3037_v1  ;;  %341 = vst.msk [vmem:[#allocation2 + $0x288] sm:$0xff] %vm259_vm2, %v3037_v1 }
  0x31   : > { %342 = vst.msk [vmem:[#allocation2 + $0x290] sm:$0xff] %vm259_vm2, %v3037_v1  ;;  %343 = vst.msk [vmem:[#allocation2 + $0x298] sm:$0xff] %vm259_vm2, %v3037_v1 }
  0x32   : > { %344 = vst.msk [vmem:[#allocation2 + $0x2a0] sm:$0xff] %vm259_vm2, %v3037_v1  ;;  %345 = vst.msk [vmem:[#allocation2 + $0x2a8] sm:$0xff] %vm259_vm2, %v3037_v1  ;;  %2756 = vmatmul.mubr.msk.bf16.gmra.mrb[16].mxu0 %vm259_vm2, %v2971_v11  ;;  %2856 = vmatmul.mubr.msk.bf16.gmra.mrb[16].mxu1 %vm259_vm2, %v2972_v12  ;;  %v411_v12 = vld [vmem:[#allocation2 + $0x1a8] sm:$0xff] }
  0x33   : > { %346 = vst.msk [vmem:[#allocation2 + $0x2b0] sm:$0xff] %vm259_vm2, %v3037_v1  ;;  %347 = vst.msk [vmem:[#allocation2 + $0x2b8] sm:$0xff] %vm259_vm2, %v3037_v1  ;;  %2759 = vmatprep.mubr.msk.bf16.mxu0 %vm3038_vm1, %v3037_v1  ;;  %2859 = vmatprep.mubr.msk.bf16.mxu1 %vm3038_vm1, %v3037_v1 }
  0x34   : > { %348 = vst.msk [vmem:[#allocation2 + $0x2c0] sm:$0xff] %vm259_vm2, %v3037_v1  ;;  %349 = vst.msk [vmem:[#allocation2 + $0x2c8] sm:$0xff] %vm259_vm2, %v3037_v1 }
  0x35   : > { %350 = vst.msk [vmem:[#allocation2 + $0x2d0] sm:$0xff] %vm259_vm2, %v3037_v1  ;;  %351 = vst.msk [vmem:[#allocation2 + $0x2d8] sm:$0xff] %vm259_vm2, %v3037_v1 }
  0x36   : > { %352 = vst.msk [vmem:[#allocation2 + $0x2e0] sm:$0xff] %vm259_vm2, %v3037_v1  ;;  %353 = vst.msk [vmem:[#allocation2 + $0x2e8] sm:$0xff] %vm259_vm2, %v3037_v1 }
  0x37   : > { %354 = vst.msk [vmem:[#allocation2 + $0x2f0] sm:$0xff] %vm259_vm2, %v3037_v1  ;;  %355 = vst.msk [vmem:[#allocation2 + $0x2f8] sm:$0xff] %vm259_vm2, %v3037_v1 }
  0x38   : > { %356 = vst.msk [vmem:[#allocation2 + $0x300] sm:$0xff] %vm259_vm2, %v3037_v1  ;;  %357 = vst.msk [vmem:[#allocation2 + $0x308] sm:$0xff] %vm259_vm2, %v3037_v1 }
  0x3a   : > { %2760 = vmatmul.mubr.msk.bf16.gmra.mrb[20].mxu0 %vm259_vm2, %v2973_v13  ;;  %2860 = vmatmul.mubr.msk.bf16.gmra.mrb[20].mxu1 %vm259_vm2, %v2974_v14 }
  0x3b   : > { %2763 = vmatprep.mubr.msk.bf16.mxu0 %vm3038_vm1, %v3037_v1  ;;  %2863 = vmatprep.mubr.msk.bf16.mxu1 %vm3038_vm1, %v3037_v1 }
  0x42   : > { %2764 = vmatmul.mubr.msk.bf16.gmra.mrb[24].mxu0 %vm259_vm2, %v2975_v15  ;;  %2864 = vmatmul.mubr.msk.bf16.gmra.mrb[24].mxu1 %vm259_vm2, %v2976_v16 }
  0x43   : > { %2767 = vmatprep.mubr.msk.bf16.mxu0 %vm3038_vm1, %v3037_v1  ;;  %2867 = vmatprep.mubr.msk.bf16.mxu1 %vm3038_vm1, %v3037_v1 }
  0x4a   : > { %2768 = vmatmul.mubr.msk.bf16.gmra.mrb[28].mxu0 %vm259_vm2, %v2977_v17  ;;  %2868 = vmatmul.mubr.msk.bf16.gmra.mrb[28].mxu1 %vm259_vm2, %v2978_v18 }
  0x4b   : > { %2771 = vmatprep.mubr.msk.bf16.mxu0 %vm3038_vm1, %v3037_v1  ;;  %2871 = vmatprep.mubr.msk.bf16.mxu1 %vm3038_vm1, %v3037_v1 }
  0x52   : > { %2772 = vmatmul.mubr.msk.bf16.gmra.mrb[32].mxu0 %vm259_vm2, %v2979_v19  ;;  %2872 = vmatmul.mubr.msk.bf16.gmra.mrb[32].mxu1 %vm259_vm2, %v2980_v20 }
  0x53   : > { %2775 = vmatprep.mubr.msk.bf16.mxu0 %vm3038_vm1, %v3037_v1  ;;  %2875 = vmatprep.mubr.msk.bf16.mxu1 %vm3038_vm1, %v3037_v1 }
  0x5a   : > { %2776 = vmatmul.mubr.msk.bf16.gmra.mrb[36].mxu0 %vm259_vm2, %v2981_v21  ;;  %2876 = vmatmul.mubr.msk.bf16.gmra.mrb[36].mxu1 %vm259_vm2, %v2982_v22 }
  0x5b   : > { %2779 = vmatprep.mubr.msk.bf16.mxu0 %vm3038_vm1, %v3037_v1  ;;  %2879 = vmatprep.mubr.msk.bf16.mxu1 %vm3038_vm1, %v3037_v1 }
  0x62   : > { %2780 = vmatmul.mubr.msk.bf16.gmra.mrb[40].mxu0 %vm259_vm2, %v2983_v23  ;;  %2880 = vmatmul.mubr.msk.bf16.gmra.mrb[40].mxu1 %vm259_vm2, %v2984_v24 }
  0x63   : > { %2783 = vmatprep.mubr.msk.bf16.mxu0 %vm3038_vm1, %v3037_v1  ;;  %2883 = vmatprep.mubr.msk.bf16.mxu1 %vm3038_vm1, %v3037_v1 }
  0x6a   : > { %2784 = vmatmul.mubr.msk.bf16.gmra.mrb[44].mxu0 %vm259_vm2, %v2985_v25  ;;  %2884 = vmatmul.mubr.msk.bf16.gmra.mrb[44].mxu1 %vm259_vm2, %v2986_v26 }
  0x6b   : > { %2787 = vmatprep.mubr.msk.bf16.mxu0 %vm3038_vm1, %v3037_v1  ;;  %2887 = vmatprep.mubr.msk.bf16.mxu1 %vm3038_vm1, %v3037_v1 }
  0x72   : > { %2788 = vmatmul.mubr.msk.bf16.gmra.mrb[48].mxu0 %vm259_vm2, %v2987_v27  ;;  %2888 = vmatmul.mubr.msk.bf16.gmra.mrb[48].mxu1 %vm259_vm2, %v2988_v28 }
  0x73   : > { %2791 = vmatprep.mubr.msk.bf16.mxu0 %vm3038_vm1, %v3037_v1  ;;  %2891 = vmatprep.mubr.msk.bf16.mxu1 %vm3038_vm1, %v3037_v1 }
  0x7a   : > { %2792 = vmatmul.mubr.msk.bf16.gmra.mrb[52].mxu0 %vm259_vm2, %v2989_v29  ;;  %2892 = vmatmul.mubr.msk.bf16.gmra.mrb[52].mxu1 %vm259_vm2, %v2990_v30 }
  0x7b   : > { %2795 = vmatprep.mubr.msk.bf16.mxu0 %vm3038_vm1, %v3037_v1  ;;  %2895 = vmatprep.mubr.msk.bf16.mxu1 %vm3038_vm1, %v3037_v1 }
  0x82   : > { %2796 = vmatmul.mubr.msk.bf16.gmra.mrb[56].mxu0 %vm259_vm2, %v2991_v31  ;;  %2896 = vmatmul.mubr.msk.bf16.gmra.mrb[56].mxu1 %vm259_vm2, %v2992_v32  ;;  %v362_v31 = vld [vmem:[#allocation2 + $0x20] sm:$0xff] }
  0x83   : > { %2799 = vmatprep.mubr.msk.bf16.mxu0 %vm3038_vm1, %v3037_v1  ;;  %2899 = vmatprep.mubr.msk.bf16.mxu1 %vm3038_vm1, %v3037_v1 }
  0x8a   : > { %2800 = vmatmul.mubr.msk.bf16.gmra.mrb[60].mxu0 %vm259_vm2, %v2993_v33  ;;  %2900 = vmatmul.mubr.msk.bf16.gmra.mrb[60].mxu1 %vm259_vm2, %v2994_v34  ;;  %v412_v33 = vld [vmem:[#allocation2 + $0x1b0] sm:$0xff] }
  0x8b   : > { %2803 = vmatprep.mubr.msk.bf16.mxu0 %vm3038_vm1, %v3037_v1  ;;  %2903 = vmatprep.mubr.msk.bf16.mxu1 %vm3038_vm1, %v3037_v1 }
  0x92   : > { %2804 = vmatmul.mubr.msk.bf16.gmra.mrb[64].mxu0 %vm259_vm2, %v2995_v35  ;;  %2904 = vmatmul.mubr.msk.bf16.gmra.mrb[64].mxu1 %vm259_vm2, %v2996_v36  ;;  %v363_v36 = vld [vmem:[#allocation2 + $0x28] sm:$0xff] }
  0x93   : > { %2807 = vmatprep.mubr.msk.bf16.mxu0 %vm3038_vm1, %v3037_v1  ;;  %2907 = vmatprep.mubr.msk.bf16.mxu1 %vm3038_vm1, %v3037_v1 }
  0x9a   : > { %2808 = vmatmul.mubr.msk.bf16.gmra.mrb[68].mxu0 %vm259_vm2, %v2997_v37  ;;  %2908 = vmatmul.mubr.msk.bf16.gmra.mrb[68].mxu1 %vm259_vm2, %v2998_v38 }
  0x9b   : > { %2811 = vmatprep.mubr.msk.bf16.mxu0 %vm3038_vm1, %v3037_v1  ;;  %2911 = vmatprep.mubr.msk.bf16.mxu1 %vm3038_vm1, %v3037_v1 }
  0xa2   : > { %2812 = vmatmul.mubr.msk.bf16.gmra.mrb[72].mxu0 %vm259_vm2, %v2999_v39  ;;  %2912 = vmatmul.mubr.msk.bf16.gmra.mrb[72].mxu1 %vm259_vm2, %v3000_v40  ;;  %v413_v40 = vld [vmem:[#allocation2 + $0x1b8] sm:$0xff] }
  0xa3   : > { %2815 = vmatprep.mubr.msk.bf16.mxu0 %vm3038_vm1, %v3037_v1  ;;  %2915 = vmatprep.mubr.msk.bf16.mxu1 %vm3038_vm1, %v3037_v1 }
  0xaa   : > { %2816 = vmatmul.mubr.msk.bf16.gmra.mrb[76].mxu0 %vm259_vm2, %v3001_v41  ;;  %2916 = vmatmul.mubr.msk.bf16.gmra.mrb[76].mxu1 %vm259_vm2, %v3002_v42 }
  0xab   : > { %2819 = vmatprep.mubr.msk.bf16.mxu0 %vm3038_vm1, %v3037_v1  ;;  %2919 = vmatprep.mubr.msk.bf16.mxu1 %vm3038_vm1, %v3037_v1 }
  0xb2   : > { %2820 = vmatmul.mubr.msk.bf16.gmra.mrb[80].mxu0 %vm259_vm2, %v3003_v43  ;;  %2920 = vmatmul.mubr.msk.bf16.gmra.mrb[80].mxu1 %vm259_vm2, %v3004_v44 }
  0xb3   : > { %2823 = vmatprep.mubr.msk.bf16.mxu0 %vm3038_vm1, %v3037_v1  ;;  %2923 = vmatprep.mubr.msk.bf16.mxu1 %vm3038_vm1, %v3037_v1 }
  0xba   : > { %2824 = vmatmul.mubr.msk.bf16.gmra.mrb[84].mxu0 %vm259_vm2, %v3005_v45  ;;  %2924 = vmatmul.mubr.msk.bf16.gmra.mrb[84].mxu1 %vm259_vm2, %v3006_v46 }
  0xbb   : > { %2827 = vmatprep.mubr.msk.bf16.mxu0 %vm3038_vm1, %v3037_v1  ;;  %2927 = vmatprep.mubr.msk.bf16.mxu1 %vm3038_vm1, %v3037_v1 }
  0xc2   : > { %2828 = vmatmul.mubr.msk.bf16.gmra.mrb[88].mxu0 %vm259_vm2, %v3007_v47  ;;  %2928 = vmatmul.mubr.msk.bf16.gmra.mrb[88].mxu1 %vm259_vm2, %v3008_v48 }
  0xc3   : > { %2831 = vmatprep.mubr.msk.bf16.mxu0 %vm3038_vm1, %v3037_v1  ;;  %2931 = vmatprep.mubr.msk.bf16.mxu1 %vm3038_vm1, %v3037_v1 }
  0xca   : > { %2832 = vmatmul.mubr.msk.bf16.gmra.mrb[92].mxu0 %vm259_vm2, %v3009_v49  ;;  %2932 = vmatmul.mubr.msk.bf16.gmra.mrb[92].mxu1 %vm259_vm2, %v3010_v50 }
  0xcb   : > { %2835 = vmatprep.mubr.msk.bf16.mxu0 %vm3038_vm1, %v3037_v1 }
  0xd2   : > { %2836 = vmatmul.mubr.msk.bf16.gmra.mrb[96].mxu0 %vm259_vm2, %v3011_v51 }
  0xe5   : > { %v986_v54 = vpop.f32.mrb[0].mxu0  ;;  %v1186_v58 = vpop.f32.mrb[0].mxu1 }
  0xe6   : > { %v1377_v56 = vadd.f32 %v986_v54, %v358_v52  ;;  %v2741_v57 = vpop.f32.mrb[1].mxu0  ;;  %v1427_v61 = vadd.f32 %v1186_v58, %v408_v53  ;;  %v2841_v62 = vpop.f32.mrb[1].mxu1 }
  0xe7   : > { %v989_v60 = vpop.f32.mrb[2].mxu0  ;;  %v1189_v2 = vpop.f32.mrb[2].mxu1 }
  0xe8   : > { %1475 = vst.msk [vmem:[#allocation2] sm:$0xff] %vm259_vm2, %v1377_v56  ;;  %v1378_v63 = vadd.f32 %v989_v60, %v359_v55  ;;  %v2742_v0 = vpop.f32.mrb[3].mxu0  ;;  %1525 = vst.msk [vmem:[#allocation2 + $0x190] sm:$0xff] %vm259_vm2, %v1427_v61  ;;  %v1428_v1 = vadd.f32 %v1189_v2, %v409_v59  ;;  %v2842_v3 = vpop.f32.mrb[3].mxu1  ;;  %v364_v59 = vld [vmem:[#allocation2 + $0x30] sm:$0xff]  ;;  %v414_v61 = vld [vmem:[#allocation2 + $0x1c0] sm:$0xff] }
  0xe9   : > { %v365_v0 = vld [vmem:[#allocation2 + $0x38] sm:$0xff] }
  0xea   : > { %1476 = vst.msk [vmem:[#allocation2 + $0x8] sm:$0xff] %vm259_vm2, %v1378_v63  ;;  %1526 = vst.msk [vmem:[#allocation2 + $0x198] sm:$0xff] %vm259_vm2, %v1428_v1 }
  0xed   : > { %v994_v7 = vpop.f32.mrb[4].mxu0  ;;  %v1194_v11 = vpop.f32.mrb[4].mxu1 }
  0xee   : > { %v1379_v9 = vadd.f32 %v994_v7, %v360_v4  ;;  %v2745_v10 = vpop.f32.mrb[5].mxu0  ;;  %v1429_v15 = vadd.f32 %v1194_v11, %v410_v5  ;;  %v2845_v16 = vpop.f32.mrb[5].mxu1  ;;  %v415_v4 = vld [vmem:[#allocation2 + $0x1c8] sm:$0xff] }
  0xef   : > { %v1576_v13 = vld [vmem:[#allocation2] sm:$0xff]  ;;  %v997_v14 = vpop.f32.mrb[6].mxu0  ;;  %v1626_v18 = vld [vmem:[#allocation2 + $0x190] sm:$0xff]  ;;  %v1197_v21 = vpop.f32.mrb[6].mxu1 }
  0xf0   : > { %v1681_v17 = vadd.f32 %v3508_v6, %v1576_v13  ;;  %1477 = vst.msk [vmem:[#allocation2 + $0x10] sm:$0xff] %vm259_vm2, %v1379_v9  ;;  %v1380_v19 = vadd.f32 %v997_v14, %v361_v8  ;;  %v2746_v20 = vpop.f32.mrb[7].mxu0  ;;  %v1731_v23 = vadd.f32 %v3508_v6, %v1626_v18  ;;  %1527 = vst.msk [vmem:[#allocation2 + $0x1a0] sm:$0xff] %vm259_vm2, %v1429_v15  ;;  %v2846_v25 = vpop.f32.mrb[7].mxu1 }
  0xf1   : > { %v1577_v22 = vld [vmem:[#allocation2 + $0x8] sm:$0xff]  ;;  %v1430_v24 = vadd.f32 %v1197_v21, %v411_v12  ;;  %v1627_v28 = vld [vmem:[#allocation2 + $0x198] sm:$0xff] }
  0xf2   : > { %v2589_v26 = vpack.c.bf16 %v1681_v17, %v1681_v17  ;;  %v1682_v27 = vadd.f32 %v3508_v6, %v1577_v22  ;;  %1478 = vst.msk [vmem:[#allocation2 + $0x18] sm:$0xff] %vm259_vm2, %v1380_v19  ;;  %v2639_v29 = vpack.c.bf16 %v1731_v23, %v1731_v23  ;;  %v1732_v30 = vadd.f32 %v3508_v6, %v1627_v28 }
  0xf3   : > { %1528 = vst.msk [vmem:[#allocation2 + $0x1a8] sm:$0xff] %vm259_vm2, %v1430_v24  ;;  %v366_v24 = vld [vmem:[#allocation2 + $0x40] sm:$0xff] }
  0xf4   : > { %2172 = vst.msk [vmem:[%s3517_s28] sm:$0xf] %vm2171_vm3, %v2589_v26  ;;  %v2590_v32 = vpack.c.bf16 %v1682_v27, %v1682_v27  ;;  %2222 = vst.msk [vmem:[%s3517_s28 + $0xc8] sm:$0xf] %vm2171_vm3, %v2639_v29  ;;  %v2640_v34 = vpack.c.bf16 %v1732_v30, %v1732_v30  ;;  %v416_v26 = vld [vmem:[#allocation2 + $0x1d0] sm:$0xff]  ;;  %v367_v29 = vld [vmem:[#allocation2 + $0x48] sm:$0xff] }
  0xf5   : > { %v1002_v35 = vpop.f32.mrb[8].mxu0  ;;  %v1202_v39 = vpop.f32.mrb[8].mxu1 }
  0xf6   : > { %2173 = vst.msk [vmem:[%s3517_s28 + $0x4] sm:$0xf] %vm2171_vm3, %v2590_v32  ;;  %v1381_v37 = vadd.f32 %v1002_v35, %v362_v31  ;;  %v2749_v38 = vpop.f32.mrb[9].mxu0  ;;  %2223 = vst.msk [vmem:[%s3517_s28 + $0xcc] sm:$0xf] %vm2171_vm3, %v2640_v34  ;;  %v1431_v43 = vadd.f32 %v1202_v39, %v412_v33  ;;  %v2849_v44 = vpop.f32.mrb[9].mxu1 }
  0xf7   : > { %v1578_v41 = vld [vmem:[#allocation2 + $0x10] sm:$0xff]  ;;  %v1005_v42 = vpop.f32.mrb[10].mxu0  ;;  %v1628_v46 = vld [vmem:[#allocation2 + $0x1a0] sm:$0xff]  ;;  %v1205_v49 = vpop.f32.mrb[10].mxu1  ;;  %v417_v33 = vld [vmem:[#allocation2 + $0x1d8] sm:$0xff] }
  0xf8   : > { %v1683_v45 = vadd.f32 %v3508_v6, %v1578_v41  ;;  %1479 = vst.msk [vmem:[#allocation2 + $0x20] sm:$0xff] %vm259_vm2, %v1381_v37  ;;  %v1382_v47 = vadd.f32 %v1005_v42, %v363_v36  ;;  %v2750_v48 = vpop.f32.mrb[11].mxu0  ;;  %v1733_v51 = vadd.f32 %v3508_v6, %v1628_v46  ;;  %1529 = vst.msk [vmem:[#allocation2 + $0x1b0] sm:$0xff] %vm259_vm2, %v1431_v43  ;;  %v2850_v53 = vpop.f32.mrb[11].mxu1 }
  0xf9   : > { %v1579_v50 = vld [vmem:[#allocation2 + $0x18] sm:$0xff]  ;;  %v1432_v52 = vadd.f32 %v1205_v49, %v413_v40 }
  0xfa   : > { %v2591_v54 = vpack.c.bf16 %v1683_v45, %v1683_v45  ;;  %v1684_v55 = vadd.f32 %v3508_v6, %v1579_v50  ;;  %v1629_v56 = vld [vmem:[#allocation2 + $0x1a8] sm:$0xff]  ;;  %1480 = vst.msk [vmem:[#allocation2 + $0x28] sm:$0xff] %vm259_vm2, %v1382_v47  ;;  %v2641_v57 = vpack.c.bf16 %v1733_v51, %v1733_v51 }
  0xfb   : > { %v1734_v58 = vadd.f32 %v3508_v6, %v1629_v56  ;;  %1530 = vst.msk [vmem:[#allocation2 + $0x1b8] sm:$0xff] %vm259_vm2, %v1432_v52  ;;  %v368_v52 = vld [vmem:[#allocation2 + $0x50] sm:$0xff] }
  0xfc   : > { %2174 = vst.msk [vmem:[%s3517_s28 + $0x8] sm:$0xf] %vm2171_vm3, %v2591_v54  ;;  %v2592_v60 = vpack.c.bf16 %v1684_v55, %v1684_v55  ;;  %2224 = vst.msk [vmem:[%s3517_s28 + $0xd0] sm:$0xf] %vm2171_vm3, %v2641_v57  ;;  %v418_v54 = vld [vmem:[#allocation2 + $0x1e0] sm:$0xff]  ;;  %v369_v57 = vld [vmem:[#allocation2 + $0x58] sm:$0xff] }
  0xfd   : > { %v2642_v62 = vpack.c.bf16 %v1734_v58, %v1734_v58  ;;  %v1010_v63 = vpop.f32.mrb[12].mxu0  ;;  %v1210_v3 = vpop.f32.mrb[12].mxu1 }
  0xfe   : > { %2175 = vst.msk [vmem:[%s3517_s28 + $0xc] sm:$0xf] %vm2171_vm3, %v2592_v60  ;;  %v1383_v2 = vadd.f32 %v1010_v63, %v364_v59  ;;  %v2753_v1 = vpop.f32.mrb[13].mxu0  ;;  %v1433_v8 = vadd.f32 %v1210_v3, %v414_v61  ;;  %v2853_v9 = vpop.f32.mrb[13].mxu1  ;;  %v419_v61 = vld [vmem:[#allocation2 + $0x1e8] sm:$0xff] }
  0xff   : > { %2225 = vst.msk [vmem:[%s3517_s28 + $0xd4] sm:$0xf] %vm2171_vm3, %v2642_v62  ;;  %v1580_v5 = vld [vmem:[#allocation2 + $0x20] sm:$0xff]  ;;  %v1013_v7 = vpop.f32.mrb[14].mxu0  ;;  %v1630_v11 = vld [vmem:[#allocation2 + $0x1b0] sm:$0xff]  ;;  %v1213_v14 = vpop.f32.mrb[14].mxu1 }
 0x100   : > { %v1685_v10 = vadd.f32 %v3508_v6, %v1580_v5  ;;  %1481 = vst.msk [vmem:[#allocation2 + $0x30] sm:$0xff] %vm259_vm2, %v1383_v2  ;;  %v1384_v12 = vadd.f32 %v1013_v7, %v365_v0  ;;  %v2754_v13 = vpop.f32.mrb[15].mxu0  ;;  %v1735_v16 = vadd.f32 %v3508_v6, %v1630_v11  ;;  %1531 = vst.msk [vmem:[#allocation2 + $0x1c0] sm:$0xff] %vm259_vm2, %v1433_v8  ;;  %v2854_v18 = vpop.f32.mrb[15].mxu1 }
 0x101   : > { %v1581_v15 = vld [vmem:[#allocation2 + $0x28] sm:$0xff]  ;;  %v1434_v17 = vadd.f32 %v1213_v14, %v415_v4 }
 0x102   : > { %v2593_v19 = vpack.c.bf16 %v1685_v10, %v1685_v10  ;;  %v1686_v20 = vadd.f32 %v3508_v6, %v1581_v15  ;;  %v1631_v21 = vld [vmem:[#allocation2 + $0x1b8] sm:$0xff]  ;;  %1482 = vst.msk [vmem:[#allocation2 + $0x38] sm:$0xff] %vm259_vm2, %v1384_v12  ;;  %v2643_v22 = vpack.c.bf16 %v1735_v16, %v1735_v16 }
 0x103   : > { %v1736_v23 = vadd.f32 %v3508_v6, %v1631_v21  ;;  %1532 = vst.msk [vmem:[#allocation2 + $0x1c8] sm:$0xff] %vm259_vm2, %v1434_v17  ;;  %v370_v17 = vld [vmem:[#allocation2 + $0x60] sm:$0xff] }
 0x104   : > { %2176 = vst.msk [vmem:[%s3517_s28 + $0x10] sm:$0xf] %vm2171_vm3, %v2593_v19  ;;  %v2594_v25 = vpack.c.bf16 %v1686_v20, %v1686_v20  ;;  %2226 = vst.msk [vmem:[%s3517_s28 + $0xd8] sm:$0xf] %vm2171_vm3, %v2643_v22  ;;  %v420_v19 = vld [vmem:[#allocation2 + $0x1f0] sm:$0xff]  ;;  %v371_v22 = vld [vmem:[#allocation2 + $0x68] sm:$0xff] }
 0x105   : > { %v2644_v27 = vpack.c.bf16 %v1736_v23, %v1736_v23  ;;  %v1018_v28 = vpop.f32.mrb[16].mxu0  ;;  %v1218_v32 = vpop.f32.mrb[16].mxu1 }
 0x106   : > { %2177 = vst.msk [vmem:[%s3517_s28 + $0x14] sm:$0xf] %vm2171_vm3, %v2594_v25  ;;  %v1385_v30 = vadd.f32 %v1018_v28, %v366_v24  ;;  %v2757_v31 = vpop.f32.mrb[17].mxu0  ;;  %v1435_v36 = vadd.f32 %v1218_v32, %v416_v26  ;;  %v2857_v37 = vpop.f32.mrb[17].mxu1  ;;  %v421_v26 = vld [vmem:[#allocation2 + $0x1f8] sm:$0xff] }
 0x107   : > { %2227 = vst.msk [vmem:[%s3517_s28 + $0xdc] sm:$0xf] %vm2171_vm3, %v2644_v27  ;;  %v1582_v34 = vld [vmem:[#allocation2 + $0x30] sm:$0xff]  ;;  %v1021_v35 = vpop.f32.mrb[18].mxu0  ;;  %v1632_v39 = vld [vmem:[#allocation2 + $0x1c0] sm:$0xff]  ;;  %v1221_v42 = vpop.f32.mrb[18].mxu1 }
 0x108   : > { %v1687_v38 = vadd.f32 %v3508_v6, %v1582_v34  ;;  %1483 = vst.msk [vmem:[#allocation2 + $0x40] sm:$0xff] %vm259_vm2, %v1385_v30  ;;  %v1386_v40 = vadd.f32 %v1021_v35, %v367_v29  ;;  %v2758_v41 = vpop.f32.mrb[19].mxu0  ;;  %v1737_v44 = vadd.f32 %v3508_v6, %v1632_v39  ;;  %1533 = vst.msk [vmem:[#allocation2 + $0x1d0] sm:$0xff] %vm259_vm2, %v1435_v36  ;;  %v2858_v46 = vpop.f32.mrb[19].mxu1 }
 0x109   : > { %v1583_v43 = vld [vmem:[#allocation2 + $0x38] sm:$0xff]  ;;  %v1436_v45 = vadd.f32 %v1221_v42, %v417_v33 }
 0x10a   : > { %v2595_v47 = vpack.c.bf16 %v1687_v38, %v1687_v38  ;;  %v1688_v48 = vadd.f32 %v3508_v6, %v1583_v43  ;;  %v1633_v49 = vld [vmem:[#allocation2 + $0x1c8] sm:$0xff]  ;;  %1484 = vst.msk [vmem:[#allocation2 + $0x48] sm:$0xff] %vm259_vm2, %v1386_v40  ;;  %v2645_v50 = vpack.c.bf16 %v1737_v44, %v1737_v44 }
 0x10b   : > { %v1738_v51 = vadd.f32 %v3508_v6, %v1633_v49  ;;  %1534 = vst.msk [vmem:[#allocation2 + $0x1d8] sm:$0xff] %vm259_vm2, %v1436_v45  ;;  %v372_v45 = vld [vmem:[#allocation2 + $0x70] sm:$0xff] }
 0x10c   : > { %2178 = vst.msk [vmem:[%s3517_s28 + $0x18] sm:$0xf] %vm2171_vm3, %v2595_v47  ;;  %v2596_v53 = vpack.c.bf16 %v1688_v48, %v1688_v48  ;;  %2228 = vst.msk [vmem:[%s3517_s28 + $0xe0] sm:$0xf] %vm2171_vm3, %v2645_v50  ;;  %v422_v47 = vld [vmem:[#allocation2 + $0x200] sm:$0xff]  ;;  %v373_v50 = vld [vmem:[#allocation2 + $0x78] sm:$0xff] }
 0x10d   : > { %v2646_v55 = vpack.c.bf16 %v1738_v51, %v1738_v51  ;;  %v1026_v56 = vpop.f32.mrb[20].mxu0  ;;  %v1226_v60 = vpop.f32.mrb[20].mxu1 }
 0x10e   : > { %2179 = vst.msk [vmem:[%s3517_s28 + $0x1c] sm:$0xf] %vm2171_vm3, %v2596_v53  ;;  %v1387_v58 = vadd.f32 %v1026_v56, %v368_v52  ;;  %v2761_v59 = vpop.f32.mrb[21].mxu0  ;;  %v1437_v0 = vadd.f32 %v1226_v60, %v418_v54  ;;  %v2861_v2 = vpop.f32.mrb[21].mxu1  ;;  %v423_v54 = vld [vmem:[#allocation2 + $0x208] sm:$0xff] }
 0x10f   : > { %2229 = vst.msk [vmem:[%s3517_s28 + $0xe4] sm:$0xf] %vm2171_vm3, %v2646_v55  ;;  %v1584_v62 = vld [vmem:[#allocation2 + $0x40] sm:$0xff]  ;;  %v1029_v63 = vpop.f32.mrb[22].mxu0  ;;  %v1634_v3 = vld [vmem:[#allocation2 + $0x1d0] sm:$0xff]  ;;  %v1229_v7 = vpop.f32.mrb[22].mxu1 }
 0x110   : > { %v1689_v1 = vadd.f32 %v3508_v6, %v1584_v62  ;;  %1485 = vst.msk [vmem:[#allocation2 + $0x50] sm:$0xff] %vm259_vm2, %v1387_v58  ;;  %v1388_v4 = vadd.f32 %v1029_v63, %v369_v57  ;;  %v2762_v5 = vpop.f32.mrb[23].mxu0  ;;  %v1739_v9 = vadd.f32 %v3508_v6, %v1634_v3  ;;  %1535 = vst.msk [vmem:[#allocation2 + $0x1e0] sm:$0xff] %vm259_vm2, %v1437_v0  ;;  %v2862_v11 = vpop.f32.mrb[23].mxu1 }
 0x111   : > { %v1585_v8 = vld [vmem:[#allocation2 + $0x48] sm:$0xff]  ;;  %v1438_v10 = vadd.f32 %v1229_v7, %v419_v61 }
 0x112   : > { %v2597_v12 = vpack.c.bf16 %v1689_v1, %v1689_v1  ;;  %v1690_v13 = vadd.f32 %v3508_v6, %v1585_v8  ;;  %v1635_v14 = vld [vmem:[#allocation2 + $0x1d8] sm:$0xff]  ;;  %1486 = vst.msk [vmem:[#allocation2 + $0x58] sm:$0xff] %vm259_vm2, %v1388_v4  ;;  %v2647_v15 = vpack.c.bf16 %v1739_v9, %v1739_v9 }
 0x113   : > { %v1740_v16 = vadd.f32 %v3508_v6, %v1635_v14  ;;  %1536 = vst.msk [vmem:[#allocation2 + $0x1e8] sm:$0xff] %vm259_vm2, %v1438_v10  ;;  %v374_v10 = vld [vmem:[#allocation2 + $0x80] sm:$0xff] }
 0x114   : > { %2180 = vst.msk [vmem:[%s3517_s28 + $0x20] sm:$0xf] %vm2171_vm3, %v2597_v12  ;;  %v2598_v18 = vpack.c.bf16 %v1690_v13, %v1690_v13  ;;  %2230 = vst.msk [vmem:[%s3517_s28 + $0xe8] sm:$0xf] %vm2171_vm3, %v2647_v15  ;;  %v424_v12 = vld [vmem:[#allocation2 + $0x210] sm:$0xff]  ;;  %v375_v15 = vld [vmem:[#allocation2 + $0x88] sm:$0xff] }
 0x115   : > { %v2648_v20 = vpack.c.bf16 %v1740_v16, %v1740_v16  ;;  %v1034_v21 = vpop.f32.mrb[24].mxu0  ;;  %v1234_v25 = vpop.f32.mrb[24].mxu1 }
 0x116   : > { %2181 = vst.msk [vmem:[%s3517_s28 + $0x24] sm:$0xf] %vm2171_vm3, %v2598_v18  ;;  %v1389_v23 = vadd.f32 %v1034_v21, %v370_v17  ;;  %v2765_v24 = vpop.f32.mrb[25].mxu0  ;;  %v1439_v29 = vadd.f32 %v1234_v25, %v420_v19  ;;  %v2865_v30 = vpop.f32.mrb[25].mxu1  ;;  %v425_v19 = vld [vmem:[#allocation2 + $0x218] sm:$0xff] }
 0x117   : > { %2231 = vst.msk [vmem:[%s3517_s28 + $0xec] sm:$0xf] %vm2171_vm3, %v2648_v20  ;;  %v1586_v27 = vld [vmem:[#allocation2 + $0x50] sm:$0xff]  ;;  %v1037_v28 = vpop.f32.mrb[26].mxu0  ;;  %v1636_v32 = vld [vmem:[#allocation2 + $0x1e0] sm:$0xff]  ;;  %v1237_v35 = vpop.f32.mrb[26].mxu1 }
 0x118   : > { %v1691_v31 = vadd.f32 %v3508_v6, %v1586_v27  ;;  %1487 = vst.msk [vmem:[#allocation2 + $0x60] sm:$0xff] %vm259_vm2, %v1389_v23  ;;  %v1390_v33 = vadd.f32 %v1037_v28, %v371_v22  ;;  %v2766_v34 = vpop.f32.mrb[27].mxu0  ;;  %v1741_v37 = vadd.f32 %v3508_v6, %v1636_v32  ;;  %1537 = vst.msk [vmem:[#allocation2 + $0x1f0] sm:$0xff] %vm259_vm2, %v1439_v29  ;;  %v2866_v39 = vpop.f32.mrb[27].mxu1 }
 0x119   : > { %v1587_v36 = vld [vmem:[#allocation2 + $0x58] sm:$0xff]  ;;  %v1440_v38 = vadd.f32 %v1237_v35, %v421_v26 }
 0x11a   : > { %v2599_v40 = vpack.c.bf16 %v1691_v31, %v1691_v31  ;;  %v1692_v41 = vadd.f32 %v3508_v6, %v1587_v36  ;;  %v1637_v42 = vld [vmem:[#allocation2 + $0x1e8] sm:$0xff]  ;;  %1488 = vst.msk [vmem:[#allocation2 + $0x68] sm:$0xff] %vm259_vm2, %v1390_v33  ;;  %v2649_v43 = vpack.c.bf16 %v1741_v37, %v1741_v37 }
 0x11b   : > { %v1742_v44 = vadd.f32 %v3508_v6, %v1637_v42  ;;  %1538 = vst.msk [vmem:[#allocation2 + $0x1f8] sm:$0xff] %vm259_vm2, %v1440_v38  ;;  %v376_v38 = vld [vmem:[#allocation2 + $0x90] sm:$0xff] }
 0x11c   : > { %2182 = vst.msk [vmem:[%s3517_s28 + $0x28] sm:$0xf] %vm2171_vm3, %v2599_v40  ;;  %v2600_v46 = vpack.c.bf16 %v1692_v41, %v1692_v41  ;;  %2232 = vst.msk [vmem:[%s3517_s28 + $0xf0] sm:$0xf] %vm2171_vm3, %v2649_v43  ;;  %v426_v40 = vld [vmem:[#allocation2 + $0x220] sm:$0xff]  ;;  %v377_v43 = vld [vmem:[#allocation2 + $0x98] sm:$0xff] }
 0x11d   : > { %v2650_v48 = vpack.c.bf16 %v1742_v44, %v1742_v44  ;;  %v1042_v49 = vpop.f32.mrb[28].mxu0  ;;  %v1242_v53 = vpop.f32.mrb[28].mxu1 }
 0x11e   : > { %2183 = vst.msk [vmem:[%s3517_s28 + $0x2c] sm:$0xf] %vm2171_vm3, %v2600_v46  ;;  %v1391_v51 = vadd.f32 %v1042_v49, %v372_v45  ;;  %v2769_v52 = vpop.f32.mrb[29].mxu0  ;;  %v1441_v57 = vadd.f32 %v1242_v53, %v422_v47  ;;  %v2869_v58 = vpop.f32.mrb[29].mxu1  ;;  %v427_v47 = vld [vmem:[#allocation2 + $0x228] sm:$0xff] }
 0x11f   : > { %2233 = vst.msk [vmem:[%s3517_s28 + $0xf4] sm:$0xf] %vm2171_vm3, %v2650_v48  ;;  %v1588_v55 = vld [vmem:[#allocation2 + $0x60] sm:$0xff]  ;;  %v1045_v56 = vpop.f32.mrb[30].mxu0  ;;  %v1638_v60 = vld [vmem:[#allocation2 + $0x1f0] sm:$0xff]  ;;  %v1245_v63 = vpop.f32.mrb[30].mxu1 }
 0x120   : > { %v1693_v59 = vadd.f32 %v3508_v6, %v1588_v55  ;;  %1489 = vst.msk [vmem:[#allocation2 + $0x70] sm:$0xff] %vm259_vm2, %v1391_v51  ;;  %v1392_v61 = vadd.f32 %v1045_v56, %v373_v50  ;;  %v2770_v62 = vpop.f32.mrb[31].mxu0  ;;  %v1743_v2 = vadd.f32 %v3508_v6, %v1638_v60  ;;  %1539 = vst.msk [vmem:[#allocation2 + $0x200] sm:$0xff] %vm259_vm2, %v1441_v57  ;;  %v2870_v3 = vpop.f32.mrb[31].mxu1 }
 0x121   : > { %v1589_v0 = vld [vmem:[#allocation2 + $0x68] sm:$0xff]  ;;  %v1442_v1 = vadd.f32 %v1245_v63, %v423_v54 }
 0x122   : > { %v2601_v4 = vpack.c.bf16 %v1693_v59, %v1693_v59  ;;  %v1694_v5 = vadd.f32 %v3508_v6, %v1589_v0  ;;  %v1639_v7 = vld [vmem:[#allocation2 + $0x1f8] sm:$0xff]  ;;  %1490 = vst.msk [vmem:[#allocation2 + $0x78] sm:$0xff] %vm259_vm2, %v1392_v61  ;;  %v2651_v8 = vpack.c.bf16 %v1743_v2, %v1743_v2 }
 0x123   : > { %v1744_v9 = vadd.f32 %v3508_v6, %v1639_v7  ;;  %1540 = vst.msk [vmem:[#allocation2 + $0x208] sm:$0xff] %vm259_vm2, %v1442_v1  ;;  %v378_v1 = vld [vmem:[#allocation2 + $0xa0] sm:$0xff] }
 0x124   : > { %2184 = vst.msk [vmem:[%s3517_s28 + $0x30] sm:$0xf] %vm2171_vm3, %v2601_v4  ;;  %v2602_v11 = vpack.c.bf16 %v1694_v5, %v1694_v5  ;;  %2234 = vst.msk [vmem:[%s3517_s28 + $0xf8] sm:$0xf] %vm2171_vm3, %v2651_v8  ;;  %v428_v4 = vld [vmem:[#allocation2 + $0x230] sm:$0xff]  ;;  %v379_v8 = vld [vmem:[#allocation2 + $0xa8] sm:$0xff] }
 0x125   : > { %v2652_v13 = vpack.c.bf16 %v1744_v9, %v1744_v9  ;;  %v1050_v14 = vpop.f32.mrb[32].mxu0  ;;  %v1250_v18 = vpop.f32.mrb[32].mxu1 }
 0x126   : > { %2185 = vst.msk [vmem:[%s3517_s28 + $0x34] sm:$0xf] %vm2171_vm3, %v2602_v11  ;;  %v1393_v16 = vadd.f32 %v1050_v14, %v374_v10  ;;  %v2773_v17 = vpop.f32.mrb[33].mxu0  ;;  %v1443_v22 = vadd.f32 %v1250_v18, %v424_v12  ;;  %v2873_v23 = vpop.f32.mrb[33].mxu1  ;;  %v429_v12 = vld [vmem:[#allocation2 + $0x238] sm:$0xff] }
 0x127   : > { %2235 = vst.msk [vmem:[%s3517_s28 + $0xfc] sm:$0xf] %vm2171_vm3, %v2652_v13  ;;  %v1590_v20 = vld [vmem:[#allocation2 + $0x70] sm:$0xff]  ;;  %v1053_v21 = vpop.f32.mrb[34].mxu0  ;;  %v1640_v25 = vld [vmem:[#allocation2 + $0x200] sm:$0xff]  ;;  %v1253_v28 = vpop.f32.mrb[34].mxu1 }
 0x128   : > { %v1695_v24 = vadd.f32 %v3508_v6, %v1590_v20  ;;  %1491 = vst.msk [vmem:[#allocation2 + $0x80] sm:$0xff] %vm259_vm2, %v1393_v16  ;;  %v1394_v26 = vadd.f32 %v1053_v21, %v375_v15  ;;  %v2774_v27 = vpop.f32.mrb[35].mxu0  ;;  %v1745_v30 = vadd.f32 %v3508_v6, %v1640_v25  ;;  %1541 = vst.msk [vmem:[#allocation2 + $0x210] sm:$0xff] %vm259_vm2, %v1443_v22  ;;  %v2874_v32 = vpop.f32.mrb[35].mxu1 }
 0x129   : > { %v1591_v29 = vld [vmem:[#allocation2 + $0x78] sm:$0xff]  ;;  %v1444_v31 = vadd.f32 %v1253_v28, %v425_v19 }
 0x12a   : > { %v2603_v33 = vpack.c.bf16 %v1695_v24, %v1695_v24  ;;  %v1696_v34 = vadd.f32 %v3508_v6, %v1591_v29  ;;  %v1641_v35 = vld [vmem:[#allocation2 + $0x208] sm:$0xff]  ;;  %1492 = vst.msk [vmem:[#allocation2 + $0x88] sm:$0xff] %vm259_vm2, %v1394_v26  ;;  %v2653_v36 = vpack.c.bf16 %v1745_v30, %v1745_v30 }
 0x12b   : > { %v1746_v37 = vadd.f32 %v3508_v6, %v1641_v35  ;;  %1542 = vst.msk [vmem:[#allocation2 + $0x218] sm:$0xff] %vm259_vm2, %v1444_v31  ;;  %v380_v31 = vld [vmem:[#allocation2 + $0xb0] sm:$0xff] }
 0x12c   : > { %2186 = vst.msk [vmem:[%s3517_s28 + $0x38] sm:$0xf] %vm2171_vm3, %v2603_v33  ;;  %v2604_v39 = vpack.c.bf16 %v1696_v34, %v1696_v34  ;;  %2236 = vst.msk [vmem:[%s3517_s28 + $0x100] sm:$0xf] %vm2171_vm3, %v2653_v36  ;;  %v430_v33 = vld [vmem:[#allocation2 + $0x240] sm:$0xff]  ;;  %v381_v36 = vld [vmem:[#allocation2 + $0xb8] sm:$0xff] }
 0x12d   : > { %v2654_v41 = vpack.c.bf16 %v1746_v37, %v1746_v37  ;;  %v1058_v42 = vpop.f32.mrb[36].mxu0  ;;  %v1258_v46 = vpop.f32.mrb[36].mxu1 }
 0x12e   : > { %2187 = vst.msk [vmem:[%s3517_s28 + $0x3c] sm:$0xf] %vm2171_vm3, %v2604_v39  ;;  %v1395_v44 = vadd.f32 %v1058_v42, %v376_v38  ;;  %v2777_v45 = vpop.f32.mrb[37].mxu0  ;;  %v1445_v50 = vadd.f32 %v1258_v46, %v426_v40  ;;  %v2877_v51 = vpop.f32.mrb[37].mxu1  ;;  %v431_v40 = vld [vmem:[#allocation2 + $0x248] sm:$0xff] }
 0x12f   : > { %2237 = vst.msk [vmem:[%s3517_s28 + $0x104] sm:$0xf] %vm2171_vm3, %v2654_v41  ;;  %v1592_v48 = vld [vmem:[#allocation2 + $0x80] sm:$0xff]  ;;  %v1061_v49 = vpop.f32.mrb[38].mxu0  ;;  %v1642_v53 = vld [vmem:[#allocation2 + $0x210] sm:$0xff]  ;;  %v1261_v56 = vpop.f32.mrb[38].mxu1 }
 0x130   : > { %v1697_v52 = vadd.f32 %v3508_v6, %v1592_v48  ;;  %1493 = vst.msk [vmem:[#allocation2 + $0x90] sm:$0xff] %vm259_vm2, %v1395_v44  ;;  %v1396_v54 = vadd.f32 %v1061_v49, %v377_v43  ;;  %v2778_v55 = vpop.f32.mrb[39].mxu0  ;;  %v1747_v58 = vadd.f32 %v3508_v6, %v1642_v53  ;;  %1543 = vst.msk [vmem:[#allocation2 + $0x220] sm:$0xff] %vm259_vm2, %v1445_v50  ;;  %v2878_v60 = vpop.f32.mrb[39].mxu1 }
 0x131   : > { %v1593_v57 = vld [vmem:[#allocation2 + $0x88] sm:$0xff]  ;;  %v1446_v59 = vadd.f32 %v1261_v56, %v427_v47 }
 0x132   : > { %v2605_v61 = vpack.c.bf16 %v1697_v52, %v1697_v52  ;;  %v1698_v62 = vadd.f32 %v3508_v6, %v1593_v57  ;;  %v1643_v63 = vld [vmem:[#allocation2 + $0x218] sm:$0xff]  ;;  %1494 = vst.msk [vmem:[#allocation2 + $0x98] sm:$0xff] %vm259_vm2, %v1396_v54  ;;  %v2655_v0 = vpack.c.bf16 %v1747_v58, %v1747_v58 }
 0x133   : > { %v1748_v2 = vadd.f32 %v3508_v6, %v1643_v63  ;;  %1544 = vst.msk [vmem:[#allocation2 + $0x228] sm:$0xff] %vm259_vm2, %v1446_v59  ;;  %v382_v59 = vld [vmem:[#allocation2 + $0xc0] sm:$0xff] }
 0x134   : > { %2188 = vst.msk [vmem:[%s3517_s28 + $0x40] sm:$0xf] %vm2171_vm3, %v2605_v61  ;;  %v2606_v3 = vpack.c.bf16 %v1698_v62, %v1698_v62  ;;  %2238 = vst.msk [vmem:[%s3517_s28 + $0x108] sm:$0xf] %vm2171_vm3, %v2655_v0  ;;  %v432_v61 = vld [vmem:[#allocation2 + $0x250] sm:$0xff]  ;;  %v383_v0 = vld [vmem:[#allocation2 + $0xc8] sm:$0xff] }
 0x135   : > { %v2656_v5 = vpack.c.bf16 %v1748_v2, %v1748_v2  ;;  %v1066_v7 = vpop.f32.mrb[40].mxu0  ;;  %v1266_v11 = vpop.f32.mrb[40].mxu1 }
 0x136   : > { %2189 = vst.msk [vmem:[%s3517_s28 + $0x44] sm:$0xf] %vm2171_vm3, %v2606_v3  ;;  %v1397_v9 = vadd.f32 %v1066_v7, %v378_v1  ;;  %v2781_v10 = vpop.f32.mrb[41].mxu0  ;;  %v1447_v15 = vadd.f32 %v1266_v11, %v428_v4  ;;  %v2881_v16 = vpop.f32.mrb[41].mxu1  ;;  %v433_v4 = vld [vmem:[#allocation2 + $0x258] sm:$0xff] }
 0x137   : > { %2239 = vst.msk [vmem:[%s3517_s28 + $0x10c] sm:$0xf] %vm2171_vm3, %v2656_v5  ;;  %v1594_v13 = vld [vmem:[#allocation2 + $0x90] sm:$0xff]  ;;  %v1069_v14 = vpop.f32.mrb[42].mxu0  ;;  %v1644_v18 = vld [vmem:[#allocation2 + $0x220] sm:$0xff]  ;;  %v1269_v21 = vpop.f32.mrb[42].mxu1 }
 0x138   : > { %v1699_v17 = vadd.f32 %v3508_v6, %v1594_v13  ;;  %1495 = vst.msk [vmem:[#allocation2 + $0xa0] sm:$0xff] %vm259_vm2, %v1397_v9  ;;  %v1398_v19 = vadd.f32 %v1069_v14, %v379_v8  ;;  %v2782_v20 = vpop.f32.mrb[43].mxu0  ;;  %v1749_v23 = vadd.f32 %v3508_v6, %v1644_v18  ;;  %1545 = vst.msk [vmem:[#allocation2 + $0x230] sm:$0xff] %vm259_vm2, %v1447_v15  ;;  %v2882_v25 = vpop.f32.mrb[43].mxu1 }
 0x139   : > { %v1595_v22 = vld [vmem:[#allocation2 + $0x98] sm:$0xff]  ;;  %v1448_v24 = vadd.f32 %v1269_v21, %v429_v12 }
 0x13a   : > { %v2607_v26 = vpack.c.bf16 %v1699_v17, %v1699_v17  ;;  %v1700_v27 = vadd.f32 %v3508_v6, %v1595_v22  ;;  %v1645_v28 = vld [vmem:[#allocation2 + $0x228] sm:$0xff]  ;;  %1496 = vst.msk [vmem:[#allocation2 + $0xa8] sm:$0xff] %vm259_vm2, %v1398_v19  ;;  %v2657_v29 = vpack.c.bf16 %v1749_v23, %v1749_v23 }
 0x13b   : > { %v1750_v30 = vadd.f32 %v3508_v6, %v1645_v28  ;;  %1546 = vst.msk [vmem:[#allocation2 + $0x238] sm:$0xff] %vm259_vm2, %v1448_v24  ;;  %v384_v24 = vld [vmem:[#allocation2 + $0xd0] sm:$0xff] }
 0x13c   : > { %2190 = vst.msk [vmem:[%s3517_s28 + $0x48] sm:$0xf] %vm2171_vm3, %v2607_v26  ;;  %v2608_v32 = vpack.c.bf16 %v1700_v27, %v1700_v27  ;;  %2240 = vst.msk [vmem:[%s3517_s28 + $0x110] sm:$0xf] %vm2171_vm3, %v2657_v29  ;;  %v434_v26 = vld [vmem:[#allocation2 + $0x260] sm:$0xff]  ;;  %v385_v29 = vld [vmem:[#allocation2 + $0xd8] sm:$0xff] }
 0x13d   : > { %v2658_v34 = vpack.c.bf16 %v1750_v30, %v1750_v30  ;;  %v1074_v35 = vpop.f32.mrb[44].mxu0  ;;  %v1274_v39 = vpop.f32.mrb[44].mxu1 }
 0x13e   : > { %2191 = vst.msk [vmem:[%s3517_s28 + $0x4c] sm:$0xf] %vm2171_vm3, %v2608_v32  ;;  %v1399_v37 = vadd.f32 %v1074_v35, %v380_v31  ;;  %v2785_v38 = vpop.f32.mrb[45].mxu0  ;;  %v1449_v43 = vadd.f32 %v1274_v39, %v430_v33  ;;  %v2885_v44 = vpop.f32.mrb[45].mxu1  ;;  %v435_v33 = vld [vmem:[#allocation2 + $0x268] sm:$0xff] }
 0x13f   : > { %2241 = vst.msk [vmem:[%s3517_s28 + $0x114] sm:$0xf] %vm2171_vm3, %v2658_v34  ;;  %v1596_v41 = vld [vmem:[#allocation2 + $0xa0] sm:$0xff]  ;;  %v1077_v42 = vpop.f32.mrb[46].mxu0  ;;  %v1646_v46 = vld [vmem:[#allocation2 + $0x230] sm:$0xff]  ;;  %v1277_v49 = vpop.f32.mrb[46].mxu1 }
 0x140   : > { %v1701_v45 = vadd.f32 %v3508_v6, %v1596_v41  ;;  %1497 = vst.msk [vmem:[#allocation2 + $0xb0] sm:$0xff] %vm259_vm2, %v1399_v37  ;;  %v1400_v47 = vadd.f32 %v1077_v42, %v381_v36  ;;  %v2786_v48 = vpop.f32.mrb[47].mxu0  ;;  %v1751_v51 = vadd.f32 %v3508_v6, %v1646_v46  ;;  %1547 = vst.msk [vmem:[#allocation2 + $0x240] sm:$0xff] %vm259_vm2, %v1449_v43  ;;  %v2886_v53 = vpop.f32.mrb[47].mxu1 }
 0x141   : > { %v1597_v50 = vld [vmem:[#allocation2 + $0xa8] sm:$0xff]  ;;  %v1450_v52 = vadd.f32 %v1277_v49, %v431_v40 }
 0x142   : > { %v2609_v54 = vpack.c.bf16 %v1701_v45, %v1701_v45  ;;  %v1702_v55 = vadd.f32 %v3508_v6, %v1597_v50  ;;  %v1647_v56 = vld [vmem:[#allocation2 + $0x238] sm:$0xff]  ;;  %1498 = vst.msk [vmem:[#allocation2 + $0xb8] sm:$0xff] %vm259_vm2, %v1400_v47  ;;  %v2659_v57 = vpack.c.bf16 %v1751_v51, %v1751_v51 }
 0x143   : > { %v1752_v58 = vadd.f32 %v3508_v6, %v1647_v56  ;;  %1548 = vst.msk [vmem:[#allocation2 + $0x248] sm:$0xff] %vm259_vm2, %v1450_v52  ;;  %v386_v52 = vld [vmem:[#allocation2 + $0xe0] sm:$0xff] }
 0x144   : > { %2192 = vst.msk [vmem:[%s3517_s28 + $0x50] sm:$0xf] %vm2171_vm3, %v2609_v54  ;;  %v2610_v60 = vpack.c.bf16 %v1702_v55, %v1702_v55  ;;  %2242 = vst.msk [vmem:[%s3517_s28 + $0x118] sm:$0xf] %vm2171_vm3, %v2659_v57  ;;  %v436_v54 = vld [vmem:[#allocation2 + $0x270] sm:$0xff]  ;;  %v387_v57 = vld [vmem:[#allocation2 + $0xe8] sm:$0xff] }
 0x145   : > { %v2660_v62 = vpack.c.bf16 %v1752_v58, %v1752_v58  ;;  %v1082_v63 = vpop.f32.mrb[48].mxu0  ;;  %v1282_v3 = vpop.f32.mrb[48].mxu1 }
 0x146   : > { %2193 = vst.msk [vmem:[%s3517_s28 + $0x54] sm:$0xf] %vm2171_vm3, %v2610_v60  ;;  %v1401_v2 = vadd.f32 %v1082_v63, %v382_v59  ;;  %v2789_v1 = vpop.f32.mrb[49].mxu0  ;;  %v1451_v8 = vadd.f32 %v1282_v3, %v432_v61  ;;  %v2889_v9 = vpop.f32.mrb[49].mxu1  ;;  %v437_v61 = vld [vmem:[#allocation2 + $0x278] sm:$0xff] }
 0x147   : > { %2243 = vst.msk [vmem:[%s3517_s28 + $0x11c] sm:$0xf] %vm2171_vm3, %v2660_v62  ;;  %v1598_v5 = vld [vmem:[#allocation2 + $0xb0] sm:$0xff]  ;;  %v1085_v7 = vpop.f32.mrb[50].mxu0  ;;  %v1648_v11 = vld [vmem:[#allocation2 + $0x240] sm:$0xff]  ;;  %v1285_v14 = vpop.f32.mrb[50].mxu1 }
 0x148   : > { %v1703_v10 = vadd.f32 %v3508_v6, %v1598_v5  ;;  %1499 = vst.msk [vmem:[#allocation2 + $0xc0] sm:$0xff] %vm259_vm2, %v1401_v2  ;;  %v1402_v12 = vadd.f32 %v1085_v7, %v383_v0  ;;  %v2790_v13 = vpop.f32.mrb[51].mxu0  ;;  %v1753_v16 = vadd.f32 %v3508_v6, %v1648_v11  ;;  %1549 = vst.msk [vmem:[#allocation2 + $0x250] sm:$0xff] %vm259_vm2, %v1451_v8  ;;  %v2890_v18 = vpop.f32.mrb[51].mxu1 }
 0x149   : > { %v1599_v15 = vld [vmem:[#allocation2 + $0xb8] sm:$0xff]  ;;  %v1452_v17 = vadd.f32 %v1285_v14, %v433_v4 }
 0x14a   : > { %v2611_v19 = vpack.c.bf16 %v1703_v10, %v1703_v10  ;;  %v1704_v20 = vadd.f32 %v3508_v6, %v1599_v15  ;;  %v1649_v21 = vld [vmem:[#allocation2 + $0x248] sm:$0xff]  ;;  %1500 = vst.msk [vmem:[#allocation2 + $0xc8] sm:$0xff] %vm259_vm2, %v1402_v12  ;;  %v2661_v22 = vpack.c.bf16 %v1753_v16, %v1753_v16 }
 0x14b   : > { %v1754_v23 = vadd.f32 %v3508_v6, %v1649_v21  ;;  %1550 = vst.msk [vmem:[#allocation2 + $0x258] sm:$0xff] %vm259_vm2, %v1452_v17  ;;  %v388_v17 = vld [vmem:[#allocation2 + $0xf0] sm:$0xff] }
 0x14c   : > { %2194 = vst.msk [vmem:[%s3517_s28 + $0x58] sm:$0xf] %vm2171_vm3, %v2611_v19  ;;  %v2612_v25 = vpack.c.bf16 %v1704_v20, %v1704_v20  ;;  %2244 = vst.msk [vmem:[%s3517_s28 + $0x120] sm:$0xf] %vm2171_vm3, %v2661_v22  ;;  %v438_v19 = vld [vmem:[#allocation2 + $0x280] sm:$0xff]  ;;  %v389_v22 = vld [vmem:[#allocation2 + $0xf8] sm:$0xff] }
 0x14d   : > { %v2662_v27 = vpack.c.bf16 %v1754_v23, %v1754_v23  ;;  %v1090_v28 = vpop.f32.mrb[52].mxu0  ;;  %v1290_v32 = vpop.f32.mrb[52].mxu1 }
 0x14e   : > { %2195 = vst.msk [vmem:[%s3517_s28 + $0x5c] sm:$0xf] %vm2171_vm3, %v2612_v25  ;;  %v1403_v30 = vadd.f32 %v1090_v28, %v384_v24  ;;  %v2793_v31 = vpop.f32.mrb[53].mxu0  ;;  %v1453_v36 = vadd.f32 %v1290_v32, %v434_v26  ;;  %v2893_v37 = vpop.f32.mrb[53].mxu1  ;;  %v439_v26 = vld [vmem:[#allocation2 + $0x288] sm:$0xff] }
 0x14f   : > { %2245 = vst.msk [vmem:[%s3517_s28 + $0x124] sm:$0xf] %vm2171_vm3, %v2662_v27  ;;  %v1600_v34 = vld [vmem:[#allocation2 + $0xc0] sm:$0xff]  ;;  %v1093_v35 = vpop.f32.mrb[54].mxu0  ;;  %v1650_v39 = vld [vmem:[#allocation2 + $0x250] sm:$0xff]  ;;  %v1293_v42 = vpop.f32.mrb[54].mxu1 }
 0x150   : > { %v1705_v38 = vadd.f32 %v3508_v6, %v1600_v34  ;;  %1501 = vst.msk [vmem:[#allocation2 + $0xd0] sm:$0xff] %vm259_vm2, %v1403_v30  ;;  %v1404_v40 = vadd.f32 %v1093_v35, %v385_v29  ;;  %v2794_v41 = vpop.f32.mrb[55].mxu0  ;;  %v1755_v44 = vadd.f32 %v3508_v6, %v1650_v39  ;;  %1551 = vst.msk [vmem:[#allocation2 + $0x260] sm:$0xff] %vm259_vm2, %v1453_v36  ;;  %v2894_v46 = vpop.f32.mrb[55].mxu1  ;;  %v3744_v30 = vld [vmem:[%s3921_s2] ss:$0 sm:$0xff] }
 0x151   : > { %v1601_v43 = vld [vmem:[#allocation2 + $0xc8] sm:$0xff]  ;;  %v1454_v45 = vadd.f32 %v1293_v42, %v435_v33 }
 0x152   : > { %v2613_v47 = vpack.c.bf16 %v1705_v38, %v1705_v38  ;;  %v1706_v48 = vadd.f32 %v3508_v6, %v1601_v43  ;;  %v1651_v49 = vld [vmem:[#allocation2 + $0x258] sm:$0xff]  ;;  %1502 = vst.msk [vmem:[#allocation2 + $0xd8] sm:$0xff] %vm259_vm2, %v1404_v40  ;;  %v2663_v50 = vpack.c.bf16 %v1755_v44, %v1755_v44 }
 0x153   : > { %v1756_v51 = vadd.f32 %v3508_v6, %v1651_v49  ;;  %1552 = vst.msk [vmem:[#allocation2 + $0x268] sm:$0xff] %vm259_vm2, %v1454_v45  ;;  %v390_v45 = vld [vmem:[#allocation2 + $0x100] sm:$0xff] }
 0x154   : > { %2196 = vst.msk [vmem:[%s3517_s28 + $0x60] sm:$0xf] %vm2171_vm3, %v2613_v47  ;;  %v2614_v53 = vpack.c.bf16 %v1706_v48, %v1706_v48  ;;  %2246 = vst.msk [vmem:[%s3517_s28 + $0x128] sm:$0xf] %vm2171_vm3, %v2663_v50  ;;  %v440_v47 = vld [vmem:[#allocation2 + $0x290] sm:$0xff]  ;;  %v391_v50 = vld [vmem:[#allocation2 + $0x108] sm:$0xff] }
 0x155   : > { %v2664_v55 = vpack.c.bf16 %v1756_v51, %v1756_v51  ;;  %v1098_v56 = vpop.f32.mrb[56].mxu0  ;;  %v1298_v60 = vpop.f32.mrb[56].mxu1 }
 0x156   : > { %2197 = vst.msk [vmem:[%s3517_s28 + $0x64] sm:$0xf] %vm2171_vm3, %v2614_v53  ;;  %v1405_v58 = vadd.f32 %v1098_v56, %v386_v52  ;;  %v2797_v59 = vpop.f32.mrb[57].mxu0  ;;  %v1455_v0 = vadd.f32 %v1298_v60, %v436_v54  ;;  %v2897_v2 = vpop.f32.mrb[57].mxu1  ;;  %v441_v54 = vld [vmem:[#allocation2 + $0x298] sm:$0xff] }
 0x157   : > { %2247 = vst.msk [vmem:[%s3517_s28 + $0x12c] sm:$0xf] %vm2171_vm3, %v2664_v55  ;;  %v1602_v62 = vld [vmem:[#allocation2 + $0xd0] sm:$0xff]  ;;  %v1101_v63 = vpop.f32.mrb[58].mxu0  ;;  %v1652_v3 = vld [vmem:[#allocation2 + $0x260] sm:$0xff]  ;;  %v1301_v7 = vpop.f32.mrb[58].mxu1 }
 0x158   : > { %v1707_v1 = vadd.f32 %v3508_v6, %v1602_v62  ;;  %1503 = vst.msk [vmem:[#allocation2 + $0xe0] sm:$0xff] %vm259_vm2, %v1405_v58  ;;  %v1406_v4 = vadd.f32 %v1101_v63, %v387_v57  ;;  %v2798_v5 = vpop.f32.mrb[59].mxu0  ;;  %v1757_v9 = vadd.f32 %v3508_v6, %v1652_v3  ;;  %1553 = vst.msk [vmem:[#allocation2 + $0x270] sm:$0xff] %vm259_vm2, %v1455_v0  ;;  %v2898_v11 = vpop.f32.mrb[59].mxu1 }
 0x159   : > { %v1603_v8 = vld [vmem:[#allocation2 + $0xd8] sm:$0xff]  ;;  %v1456_v10 = vadd.f32 %v1301_v7, %v437_v61 }
 0x15a   : > { %v2615_v12 = vpack.c.bf16 %v1707_v1, %v1707_v1  ;;  %v1708_v13 = vadd.f32 %v3508_v6, %v1603_v8  ;;  %v1653_v14 = vld [vmem:[#allocation2 + $0x268] sm:$0xff]  ;;  %1504 = vst.msk [vmem:[#allocation2 + $0xe8] sm:$0xff] %vm259_vm2, %v1406_v4  ;;  %v2665_v15 = vpack.c.bf16 %v1757_v9, %v1757_v9 }
 0x15b   : > { %v1758_v16 = vadd.f32 %v3508_v6, %v1653_v14  ;;  %1554 = vst.msk [vmem:[#allocation2 + $0x278] sm:$0xff] %vm259_vm2, %v1456_v10  ;;  %v392_v10 = vld [vmem:[#allocation2 + $0x110] sm:$0xff] }
 0x15c   : > { %2198 = vst.msk [vmem:[%s3517_s28 + $0x68] sm:$0xf] %vm2171_vm3, %v2615_v12  ;;  %v2616_v18 = vpack.c.bf16 %v1708_v13, %v1708_v13  ;;  %2248 = vst.msk [vmem:[%s3517_s28 + $0x130] sm:$0xf] %vm2171_vm3, %v2665_v15  ;;  %v442_v12 = vld [vmem:[#allocation2 + $0x2a0] sm:$0xff]  ;;  %v393_v15 = vld [vmem:[#allocation2 + $0x118] sm:$0xff] }
 0x15d   : > { %v2666_v20 = vpack.c.bf16 %v1758_v16, %v1758_v16  ;;  %v1106_v21 = vpop.f32.mrb[60].mxu0  ;;  %v1306_v25 = vpop.f32.mrb[60].mxu1 }
 0x15e   : > { %2199 = vst.msk [vmem:[%s3517_s28 + $0x6c] sm:$0xf] %vm2171_vm3, %v2616_v18  ;;  %v1407_v23 = vadd.f32 %v1106_v21, %v388_v17  ;;  %v2801_v24 = vpop.f32.mrb[61].mxu0  ;;  %v1457_v28 = vadd.f32 %v1306_v25, %v438_v19  ;;  %v2901_v29 = vpop.f32.mrb[61].mxu1  ;;  %v443_v19 = vld [vmem:[#allocation2 + $0x2a8] sm:$0xff] }
 0x15f   : > { %2249 = vst.msk [vmem:[%s3517_s28 + $0x134] sm:$0xf] %vm2171_vm3, %v2666_v20  ;;  %v1604_v6 = vld [vmem:[#allocation2 + $0xe0] sm:$0xff]  ;;  %v1109_v27 = vpop.f32.mrb[62].mxu0  ;;  %v1654_v32 = vld [vmem:[#allocation2 + $0x270] sm:$0xff]  ;;  %v1309_v35 = vpop.f32.mrb[62].mxu1 }
 0x160   : > { %v1709_v31 = vadd.f32 %v3744_v30, %v1604_v6  ;;  %1505 = vst.msk [vmem:[#allocation2 + $0xf0] sm:$0xff] %vm259_vm2, %v1407_v23  ;;  %v1408_v33 = vadd.f32 %v1109_v27, %v389_v22  ;;  %v2802_v34 = vpop.f32.mrb[63].mxu0  ;;  %v1759_v37 = vadd.f32 %v3744_v30, %v1654_v32  ;;  %1555 = vst.msk [vmem:[#allocation2 + $0x280] sm:$0xff] %vm259_vm2, %v1457_v28  ;;  %v2902_v39 = vpop.f32.mrb[63].mxu1 }
 0x161   : > { %v1605_v36 = vld [vmem:[#allocation2 + $0xe8] sm:$0xff]  ;;  %v1458_v38 = vadd.f32 %v1309_v35, %v439_v26 }
 0x162   : > { %v2617_v40 = vpack.c.bf16 %v1709_v31, %v1709_v31  ;;  %v1710_v41 = vadd.f32 %v3744_v30, %v1605_v36  ;;  %v1655_v42 = vld [vmem:[#allocation2 + $0x278] sm:$0xff]  ;;  %1506 = vst.msk [vmem:[#allocation2 + $0xf8] sm:$0xff] %vm259_vm2, %v1408_v33  ;;  %v2667_v43 = vpack.c.bf16 %v1759_v37, %v1759_v37 }
 0x163   : > { %v1760_v44 = vadd.f32 %v3744_v30, %v1655_v42  ;;  %1556 = vst.msk [vmem:[#allocation2 + $0x288] sm:$0xff] %vm259_vm2, %v1458_v38  ;;  %v394_v38 = vld [vmem:[#allocation2 + $0x120] sm:$0xff] }
 0x164   : > { %2200 = vst.msk [vmem:[%s3517_s28 + $0x70] sm:$0xf] %vm2171_vm3, %v2617_v40  ;;  %v2618_v46 = vpack.c.bf16 %v1710_v41, %v1710_v41  ;;  %2250 = vst.msk [vmem:[%s3517_s28 + $0x138] sm:$0xf] %vm2171_vm3, %v2667_v43  ;;  %v444_v40 = vld [vmem:[#allocation2 + $0x2b0] sm:$0xff]  ;;  %v395_v43 = vld [vmem:[#allocation2 + $0x128] sm:$0xff] }
 0x165   : > { %v2668_v48 = vpack.c.bf16 %v1760_v44, %v1760_v44  ;;  %v1114_v49 = vpop.f32.mrb[64].mxu0  ;;  %v1314_v53 = vpop.f32.mrb[64].mxu1 }
 0x166   : > { %2201 = vst.msk [vmem:[%s3517_s28 + $0x74] sm:$0xf] %vm2171_vm3, %v2618_v46  ;;  %v1409_v51 = vadd.f32 %v1114_v49, %v390_v45  ;;  %v2805_v52 = vpop.f32.mrb[65].mxu0  ;;  %v1459_v57 = vadd.f32 %v1314_v53, %v440_v47  ;;  %v2905_v58 = vpop.f32.mrb[65].mxu1  ;;  %v445_v47 = vld [vmem:[#allocation2 + $0x2b8] sm:$0xff] }
 0x167   : > { %2251 = vst.msk [vmem:[%s3517_s28 + $0x13c] sm:$0xf] %vm2171_vm3, %v2668_v48  ;;  %v1606_v55 = vld [vmem:[#allocation2 + $0xf0] sm:$0xff]  ;;  %v1117_v56 = vpop.f32.mrb[66].mxu0  ;;  %v1656_v60 = vld [vmem:[#allocation2 + $0x280] sm:$0xff]  ;;  %v1317_v63 = vpop.f32.mrb[66].mxu1 }
 0x168   : > { %v1711_v59 = vadd.f32 %v3744_v30, %v1606_v55  ;;  %1507 = vst.msk [vmem:[#allocation2 + $0x100] sm:$0xff] %vm259_vm2, %v1409_v51  ;;  %v1410_v61 = vadd.f32 %v1117_v56, %v391_v50  ;;  %v2806_v62 = vpop.f32.mrb[67].mxu0  ;;  %v1761_v2 = vadd.f32 %v3744_v30, %v1656_v60  ;;  %1557 = vst.msk [vmem:[#allocation2 + $0x290] sm:$0xff] %vm259_vm2, %v1459_v57  ;;  %v2906_v3 = vpop.f32.mrb[67].mxu1 }
 0x169   : > { %v1607_v0 = vld [vmem:[#allocation2 + $0xf8] sm:$0xff]  ;;  %v1460_v1 = vadd.f32 %v1317_v63, %v441_v54 }
 0x16a   : > { %v2619_v4 = vpack.c.bf16 %v1711_v59, %v1711_v59  ;;  %v1712_v5 = vadd.f32 %v3744_v30, %v1607_v0  ;;  %v1657_v7 = vld [vmem:[#allocation2 + $0x288] sm:$0xff]  ;;  %1508 = vst.msk [vmem:[#allocation2 + $0x108] sm:$0xff] %vm259_vm2, %v1410_v61  ;;  %v2669_v8 = vpack.c.bf16 %v1761_v2, %v1761_v2 }
 0x16b   : > { %v1762_v9 = vadd.f32 %v3744_v30, %v1657_v7  ;;  %1558 = vst.msk [vmem:[#allocation2 + $0x298] sm:$0xff] %vm259_vm2, %v1460_v1  ;;  %v396_v1 = vld [vmem:[#allocation2 + $0x130] sm:$0xff] }
 0x16c   : > { %2202 = vst.msk [vmem:[%s3517_s28 + $0x78] sm:$0xf] %vm2171_vm3, %v2619_v4  ;;  %v2620_v11 = vpack.c.bf16 %v1712_v5, %v1712_v5  ;;  %2252 = vst.msk [vmem:[%s3517_s28 + $0x140] sm:$0xf] %vm2171_vm3, %v2669_v8  ;;  %v446_v4 = vld [vmem:[#allocation2 + $0x2c0] sm:$0xff]  ;;  %v397_v8 = vld [vmem:[#allocation2 + $0x138] sm:$0xff] }
 0x16d   : > { %v2670_v13 = vpack.c.bf16 %v1762_v9, %v1762_v9  ;;  %v1122_v14 = vpop.f32.mrb[68].mxu0  ;;  %v1322_v18 = vpop.f32.mrb[68].mxu1 }
 0x16e   : > { %2203 = vst.msk [vmem:[%s3517_s28 + $0x7c] sm:$0xf] %vm2171_vm3, %v2620_v11  ;;  %v1411_v16 = vadd.f32 %v1122_v14, %v392_v10  ;;  %v2809_v17 = vpop.f32.mrb[69].mxu0  ;;  %v1461_v22 = vadd.f32 %v1322_v18, %v442_v12  ;;  %v2909_v23 = vpop.f32.mrb[69].mxu1  ;;  %v447_v12 = vld [vmem:[#allocation2 + $0x2c8] sm:$0xff] }
 0x16f   : > { %2253 = vst.msk [vmem:[%s3517_s28 + $0x144] sm:$0xf] %vm2171_vm3, %v2670_v13  ;;  %v1608_v20 = vld [vmem:[#allocation2 + $0x100] sm:$0xff]  ;;  %v1125_v21 = vpop.f32.mrb[70].mxu0  ;;  %v1658_v25 = vld [vmem:[#allocation2 + $0x290] sm:$0xff]  ;;  %v1325_v27 = vpop.f32.mrb[70].mxu1 }
 0x170   : > { %v1713_v24 = vadd.f32 %v3744_v30, %v1608_v20  ;;  %1509 = vst.msk [vmem:[#allocation2 + $0x110] sm:$0xff] %vm259_vm2, %v1411_v16  ;;  %v1412_v26 = vadd.f32 %v1125_v21, %v393_v15  ;;  %v2810_v6 = vpop.f32.mrb[71].mxu0  ;;  %v1763_v29 = vadd.f32 %v3744_v30, %v1658_v25  ;;  %1559 = vst.msk [vmem:[#allocation2 + $0x2a0] sm:$0xff] %vm259_vm2, %v1461_v22  ;;  %v2910_v32 = vpop.f32.mrb[71].mxu1 }
 0x171   : > { %v1609_v28 = vld [vmem:[#allocation2 + $0x108] sm:$0xff]  ;;  %v1462_v31 = vadd.f32 %v1325_v27, %v443_v19 }
 0x172   : > { %v2621_v33 = vpack.c.bf16 %v1713_v24, %v1713_v24  ;;  %v1714_v34 = vadd.f32 %v3744_v30, %v1609_v28  ;;  %v1659_v35 = vld [vmem:[#allocation2 + $0x298] sm:$0xff]  ;;  %1510 = vst.msk [vmem:[#allocation2 + $0x118] sm:$0xff] %vm259_vm2, %v1412_v26  ;;  %v2671_v36 = vpack.c.bf16 %v1763_v29, %v1763_v29 }
 0x173   : > { %v1764_v37 = vadd.f32 %v3744_v30, %v1659_v35  ;;  %1560 = vst.msk [vmem:[#allocation2 + $0x2a8] sm:$0xff] %vm259_vm2, %v1462_v31  ;;  %v398_v31 = vld [vmem:[#allocation2 + $0x140] sm:$0xff] }
 0x174   : > { %2204 = vst.msk [vmem:[%s3517_s28 + $0x80] sm:$0xf] %vm2171_vm3, %v2621_v33  ;;  %v2622_v39 = vpack.c.bf16 %v1714_v34, %v1714_v34  ;;  %2254 = vst.msk [vmem:[%s3517_s28 + $0x148] sm:$0xf] %vm2171_vm3, %v2671_v36  ;;  %v448_v33 = vld [vmem:[#allocation2 + $0x2d0] sm:$0xff]  ;;  %v399_v36 = vld [vmem:[#allocation2 + $0x148] sm:$0xff] }
 0x175   : > { %v2672_v41 = vpack.c.bf16 %v1764_v37, %v1764_v37  ;;  %v1130_v42 = vpop.f32.mrb[72].mxu0  ;;  %v1330_v46 = vpop.f32.mrb[72].mxu1 }
 0x176   : > { %2205 = vst.msk [vmem:[%s3517_s28 + $0x84] sm:$0xf] %vm2171_vm3, %v2622_v39  ;;  %v1413_v44 = vadd.f32 %v1130_v42, %v394_v38  ;;  %v2813_v45 = vpop.f32.mrb[73].mxu0  ;;  %v1463_v50 = vadd.f32 %v1330_v46, %v444_v40  ;;  %v2913_v51 = vpop.f32.mrb[73].mxu1  ;;  %v449_v40 = vld [vmem:[#allocation2 + $0x2d8] sm:$0xff] }
 0x177   : > { %2255 = vst.msk [vmem:[%s3517_s28 + $0x14c] sm:$0xf] %vm2171_vm3, %v2672_v41  ;;  %v1610_v48 = vld [vmem:[#allocation2 + $0x110] sm:$0xff]  ;;  %v1133_v49 = vpop.f32.mrb[74].mxu0  ;;  %v1660_v53 = vld [vmem:[#allocation2 + $0x2a0] sm:$0xff]  ;;  %v1333_v56 = vpop.f32.mrb[74].mxu1 }
 0x178   : > { %v1715_v52 = vadd.f32 %v3744_v30, %v1610_v48  ;;  %1511 = vst.msk [vmem:[#allocation2 + $0x120] sm:$0xff] %vm259_vm2, %v1413_v44  ;;  %v1414_v54 = vadd.f32 %v1133_v49, %v395_v43  ;;  %v2814_v55 = vpop.f32.mrb[75].mxu0  ;;  %v1765_v58 = vadd.f32 %v3744_v30, %v1660_v53  ;;  %1561 = vst.msk [vmem:[#allocation2 + $0x2b0] sm:$0xff] %vm259_vm2, %v1463_v50  ;;  %v2914_v60 = vpop.f32.mrb[75].mxu1 }
 0x179   : > { %v1611_v57 = vld [vmem:[#allocation2 + $0x118] sm:$0xff]  ;;  %v1464_v59 = vadd.f32 %v1333_v56, %v445_v47 }
 0x17a   : > { %v2623_v61 = vpack.c.bf16 %v1715_v52, %v1715_v52  ;;  %v1716_v62 = vadd.f32 %v3744_v30, %v1611_v57  ;;  %v1661_v63 = vld [vmem:[#allocation2 + $0x2a8] sm:$0xff]  ;;  %1512 = vst.msk [vmem:[#allocation2 + $0x128] sm:$0xff] %vm259_vm2, %v1414_v54  ;;  %v2673_v0 = vpack.c.bf16 %v1765_v58, %v1765_v58 }
 0x17b   : > { %v1766_v2 = vadd.f32 %v3744_v30, %v1661_v63  ;;  %1562 = vst.msk [vmem:[#allocation2 + $0x2b8] sm:$0xff] %vm259_vm2, %v1464_v59  ;;  %v400_v59 = vld [vmem:[#allocation2 + $0x150] sm:$0xff] }
 0x17c   : > { %2206 = vst.msk [vmem:[%s3517_s28 + $0x88] sm:$0xf] %vm2171_vm3, %v2623_v61  ;;  %v2624_v3 = vpack.c.bf16 %v1716_v62, %v1716_v62  ;;  %2256 = vst.msk [vmem:[%s3517_s28 + $0x150] sm:$0xf] %vm2171_vm3, %v2673_v0  ;;  %v450_v61 = vld [vmem:[#allocation2 + $0x2e0] sm:$0xff]  ;;  %v401_v0 = vld [vmem:[#allocation2 + $0x158] sm:$0xff] }
 0x17d   : > { %v2674_v5 = vpack.c.bf16 %v1766_v2, %v1766_v2  ;;  %v1138_v7 = vpop.f32.mrb[76].mxu0  ;;  %v1338_v11 = vpop.f32.mrb[76].mxu1 }
 0x17e   : > { %2207 = vst.msk [vmem:[%s3517_s28 + $0x8c] sm:$0xf] %vm2171_vm3, %v2624_v3  ;;  %v1415_v9 = vadd.f32 %v1138_v7, %v396_v1  ;;  %v2817_v10 = vpop.f32.mrb[77].mxu0  ;;  %v1465_v15 = vadd.f32 %v1338_v11, %v446_v4  ;;  %v2917_v16 = vpop.f32.mrb[77].mxu1  ;;  %v451_v4 = vld [vmem:[#allocation2 + $0x2e8] sm:$0xff] }
 0x17f   : > { %2257 = vst.msk [vmem:[%s3517_s28 + $0x154] sm:$0xf] %vm2171_vm3, %v2674_v5  ;;  %v1612_v13 = vld [vmem:[#allocation2 + $0x120] sm:$0xff]  ;;  %v1141_v14 = vpop.f32.mrb[78].mxu0  ;;  %v1662_v18 = vld [vmem:[#allocation2 + $0x2b0] sm:$0xff]  ;;  %v1341_v21 = vpop.f32.mrb[78].mxu1 }
 0x180   : > { %v1717_v17 = vadd.f32 %v3744_v30, %v1612_v13  ;;  %1513 = vst.msk [vmem:[#allocation2 + $0x130] sm:$0xff] %vm259_vm2, %v1415_v9  ;;  %v1416_v19 = vadd.f32 %v1141_v14, %v397_v8  ;;  %v2818_v20 = vpop.f32.mrb[79].mxu0  ;;  %v1767_v23 = vadd.f32 %v3744_v30, %v1662_v18  ;;  %1563 = vst.msk [vmem:[#allocation2 + $0x2c0] sm:$0xff] %vm259_vm2, %v1465_v15  ;;  %v2918_v25 = vpop.f32.mrb[79].mxu1 }
 0x181   : > { %v1613_v22 = vld [vmem:[#allocation2 + $0x128] sm:$0xff]  ;;  %v1466_v24 = vadd.f32 %v1341_v21, %v447_v12 }
 0x182   : > { %v2625_v26 = vpack.c.bf16 %v1717_v17, %v1717_v17  ;;  %v1718_v6 = vadd.f32 %v3744_v30, %v1613_v22  ;;  %v1663_v27 = vld [vmem:[#allocation2 + $0x2b8] sm:$0xff]  ;;  %1514 = vst.msk [vmem:[#allocation2 + $0x138] sm:$0xff] %vm259_vm2, %v1416_v19  ;;  %v2675_v28 = vpack.c.bf16 %v1767_v23, %v1767_v23 }
 0x183   : > { %v1768_v29 = vadd.f32 %v3744_v30, %v1663_v27  ;;  %1564 = vst.msk [vmem:[#allocation2 + $0x2c8] sm:$0xff] %vm259_vm2, %v1466_v24  ;;  %v402_v24 = vld [vmem:[#allocation2 + $0x160] sm:$0xff] }
 0x184   : > { %2208 = vst.msk [vmem:[%s3517_s28 + $0x90] sm:$0xf] %vm2171_vm3, %v2625_v26  ;;  %v2626_v32 = vpack.c.bf16 %v1718_v6, %v1718_v6  ;;  %2258 = vst.msk [vmem:[%s3517_s28 + $0x158] sm:$0xf] %vm2171_vm3, %v2675_v28  ;;  %v452_v26 = vld [vmem:[#allocation2 + $0x2f0] sm:$0xff]  ;;  %v403_v28 = vld [vmem:[#allocation2 + $0x168] sm:$0xff] }
 0x185   : > { %v2676_v34 = vpack.c.bf16 %v1768_v29, %v1768_v29  ;;  %v1146_v35 = vpop.f32.mrb[80].mxu0  ;;  %v1346_v39 = vpop.f32.mrb[80].mxu1 }
 0x186   : > { %2209 = vst.msk [vmem:[%s3517_s28 + $0x94] sm:$0xf] %vm2171_vm3, %v2626_v32  ;;  %v1417_v37 = vadd.f32 %v1146_v35, %v398_v31  ;;  %v2821_v38 = vpop.f32.mrb[81].mxu0  ;;  %v1467_v43 = vadd.f32 %v1346_v39, %v448_v33  ;;  %v2921_v44 = vpop.f32.mrb[81].mxu1  ;;  %v453_v33 = vld [vmem:[#allocation2 + $0x2f8] sm:$0xff] }
 0x187   : > { %2259 = vst.msk [vmem:[%s3517_s28 + $0x15c] sm:$0xf] %vm2171_vm3, %v2676_v34  ;;  %v1614_v41 = vld [vmem:[#allocation2 + $0x130] sm:$0xff]  ;;  %v1149_v42 = vpop.f32.mrb[82].mxu0  ;;  %v1664_v46 = vld [vmem:[#allocation2 + $0x2c0] sm:$0xff]  ;;  %v1349_v49 = vpop.f32.mrb[82].mxu1 }
 0x188   : > { %v1719_v45 = vadd.f32 %v3744_v30, %v1614_v41  ;;  %1515 = vst.msk [vmem:[#allocation2 + $0x140] sm:$0xff] %vm259_vm2, %v1417_v37  ;;  %v1418_v47 = vadd.f32 %v1149_v42, %v399_v36  ;;  %v2822_v48 = vpop.f32.mrb[83].mxu0  ;;  %v1769_v51 = vadd.f32 %v3744_v30, %v1664_v46  ;;  %1565 = vst.msk [vmem:[#allocation2 + $0x2d0] sm:$0xff] %vm259_vm2, %v1467_v43  ;;  %v2922_v53 = vpop.f32.mrb[83].mxu1 }
 0x189   : > { %v1615_v50 = vld [vmem:[#allocation2 + $0x138] sm:$0xff]  ;;  %v1468_v52 = vadd.f32 %v1349_v49, %v449_v40 }
 0x18a   : > { %v2627_v54 = vpack.c.bf16 %v1719_v45, %v1719_v45  ;;  %v1720_v55 = vadd.f32 %v3744_v30, %v1615_v50  ;;  %v1665_v56 = vld [vmem:[#allocation2 + $0x2c8] sm:$0xff]  ;;  %1516 = vst.msk [vmem:[#allocation2 + $0x148] sm:$0xff] %vm259_vm2, %v1418_v47  ;;  %v2677_v57 = vpack.c.bf16 %v1769_v51, %v1769_v51 }
 0x18b   : > { %v1770_v58 = vadd.f32 %v3744_v30, %v1665_v56  ;;  %1566 = vst.msk [vmem:[#allocation2 + $0x2d8] sm:$0xff] %vm259_vm2, %v1468_v52  ;;  %v404_v52 = vld [vmem:[#allocation2 + $0x170] sm:$0xff] }
 0x18c   : > { %2210 = vst.msk [vmem:[%s3517_s28 + $0x98] sm:$0xf] %vm2171_vm3, %v2627_v54  ;;  %v2628_v60 = vpack.c.bf16 %v1720_v55, %v1720_v55  ;;  %2260 = vst.msk [vmem:[%s3517_s28 + $0x160] sm:$0xf] %vm2171_vm3, %v2677_v57  ;;  %v454_v54 = vld [vmem:[#allocation2 + $0x300] sm:$0xff]  ;;  %v405_v57 = vld [vmem:[#allocation2 + $0x178] sm:$0xff] }
 0x18d   : > { %v2678_v62 = vpack.c.bf16 %v1770_v58, %v1770_v58  ;;  %v1154_v63 = vpop.f32.mrb[84].mxu0  ;;  %v1354_v3 = vpop.f32.mrb[84].mxu1 }
 0x18e   : > { %2211 = vst.msk [vmem:[%s3517_s28 + $0x9c] sm:$0xf] %vm2171_vm3, %v2628_v60  ;;  %v1419_v2 = vadd.f32 %v1154_v63, %v400_v59  ;;  %v2825_v1 = vpop.f32.mrb[85].mxu0  ;;  %v1469_v8 = vadd.f32 %v1354_v3, %v450_v61  ;;  %v2925_v9 = vpop.f32.mrb[85].mxu1  ;;  %v455_v61 = vld [vmem:[#allocation2 + $0x308] sm:$0xff] }
 0x18f   : > { %2261 = vst.msk [vmem:[%s3517_s28 + $0x164] sm:$0xf] %vm2171_vm3, %v2678_v62  ;;  %v1616_v5 = vld [vmem:[#allocation2 + $0x140] sm:$0xff]  ;;  %v1157_v7 = vpop.f32.mrb[86].mxu0  ;;  %v1666_v11 = vld [vmem:[#allocation2 + $0x2d0] sm:$0xff]  ;;  %v1357_v14 = vpop.f32.mrb[86].mxu1 }
 0x190   : > { %v1721_v10 = vadd.f32 %v3744_v30, %v1616_v5  ;;  %1517 = vst.msk [vmem:[#allocation2 + $0x150] sm:$0xff] %vm259_vm2, %v1419_v2  ;;  %v1420_v12 = vadd.f32 %v1157_v7, %v401_v0  ;;  %v2826_v13 = vpop.f32.mrb[87].mxu0  ;;  %v1771_v16 = vadd.f32 %v3744_v30, %v1666_v11  ;;  %1567 = vst.msk [vmem:[#allocation2 + $0x2e0] sm:$0xff] %vm259_vm2, %v1469_v8  ;;  %v2926_v18 = vpop.f32.mrb[87].mxu1 }
 0x191   : > { %v1617_v15 = vld [vmem:[#allocation2 + $0x148] sm:$0xff]  ;;  %v1470_v17 = vadd.f32 %v1357_v14, %v451_v4 }
 0x192   : > { %v2629_v19 = vpack.c.bf16 %v1721_v10, %v1721_v10  ;;  %v1722_v20 = vadd.f32 %v3744_v30, %v1617_v15  ;;  %v1667_v21 = vld [vmem:[#allocation2 + $0x2d8] sm:$0xff]  ;;  %1518 = vst.msk [vmem:[#allocation2 + $0x158] sm:$0xff] %vm259_vm2, %v1420_v12  ;;  %v2679_v22 = vpack.c.bf16 %v1771_v16, %v1771_v16 }
 0x193   : > { %v1772_v23 = vadd.f32 %v3744_v30, %v1667_v21  ;;  %1568 = vst.msk [vmem:[#allocation2 + $0x2e8] sm:$0xff] %vm259_vm2, %v1470_v17  ;;  %v406_v17 = vld [vmem:[#allocation2 + $0x180] sm:$0xff]  ;;  %v407_v21 = vld [vmem:[#allocation2 + $0x188] sm:$0xff] }
 0x194   : > { %2212 = vst.msk [vmem:[%s3517_s28 + $0xa0] sm:$0xf] %vm2171_vm3, %v2629_v19  ;;  %v2630_v25 = vpack.c.bf16 %v1722_v20, %v1722_v20  ;;  %2262 = vst.msk [vmem:[%s3517_s28 + $0x168] sm:$0xf] %vm2171_vm3, %v2679_v22 }
 0x195   : > { %v2680_v6 = vpack.c.bf16 %v1772_v23, %v1772_v23  ;;  %v1162_v27 = vpop.f32.mrb[88].mxu0  ;;  %v1362_v32 = vpop.f32.mrb[88].mxu1 }
 0x196   : > { %2213 = vst.msk [vmem:[%s3517_s28 + $0xa4] sm:$0xf] %vm2171_vm3, %v2630_v25  ;;  %v1421_v29 = vadd.f32 %v1162_v27, %v402_v24  ;;  %v2829_v31 = vpop.f32.mrb[89].mxu0  ;;  %v1471_v36 = vadd.f32 %v1362_v32, %v452_v26  ;;  %v2929_v37 = vpop.f32.mrb[89].mxu1 }
 0x197   : > { %2263 = vst.msk [vmem:[%s3517_s28 + $0x16c] sm:$0xf] %vm2171_vm3, %v2680_v6  ;;  %v1618_v34 = vld [vmem:[#allocation2 + $0x150] sm:$0xff]  ;;  %v1165_v35 = vpop.f32.mrb[90].mxu0  ;;  %v1668_v39 = vld [vmem:[#allocation2 + $0x2e0] sm:$0xff]  ;;  %v1365_v42 = vpop.f32.mrb[90].mxu1 }
 0x198   : > { %v1723_v38 = vadd.f32 %v3744_v30, %v1618_v34  ;;  %1519 = vst.msk [vmem:[#allocation2 + $0x160] sm:$0xff] %vm259_vm2, %v1421_v29  ;;  %v1422_v40 = vadd.f32 %v1165_v35, %v403_v28  ;;  %v2830_v41 = vpop.f32.mrb[91].mxu0  ;;  %v1773_v44 = vadd.f32 %v3744_v30, %v1668_v39  ;;  %1569 = vst.msk [vmem:[#allocation2 + $0x2f0] sm:$0xff] %vm259_vm2, %v1471_v36  ;;  %v2930_v46 = vpop.f32.mrb[91].mxu1 }
 0x199   : > { %v1619_v43 = vld [vmem:[#allocation2 + $0x158] sm:$0xff]  ;;  %v1472_v45 = vadd.f32 %v1365_v42, %v453_v33 }
 0x19a   : > { %v2631_v47 = vpack.c.bf16 %v1723_v38, %v1723_v38  ;;  %v1724_v48 = vadd.f32 %v3744_v30, %v1619_v43  ;;  %v1669_v49 = vld [vmem:[#allocation2 + $0x2e8] sm:$0xff]  ;;  %1520 = vst.msk [vmem:[#allocation2 + $0x168] sm:$0xff] %vm259_vm2, %v1422_v40  ;;  %v2681_v50 = vpack.c.bf16 %v1773_v44, %v1773_v44 }
 0x19b   : > { %v1774_v51 = vadd.f32 %v3744_v30, %v1669_v49  ;;  %1570 = vst.msk [vmem:[#allocation2 + $0x2f8] sm:$0xff] %vm259_vm2, %v1472_v45 }
 0x19c   : > { %2214 = vst.msk [vmem:[%s3517_s28 + $0xa8] sm:$0xf] %vm2171_vm3, %v2631_v47  ;;  %v2632_v53 = vpack.c.bf16 %v1724_v48, %v1724_v48  ;;  %2264 = vst.msk [vmem:[%s3517_s28 + $0x170] sm:$0xf] %vm2171_vm3, %v2681_v50 }
 0x19d   : > { %v2682_v55 = vpack.c.bf16 %v1774_v51, %v1774_v51  ;;  %v1170_v56 = vpop.f32.mrb[92].mxu0  ;;  %v1370_v60 = vpop.f32.mrb[92].mxu1 }
 0x19e   : > { %2215 = vst.msk [vmem:[%s3517_s28 + $0xac] sm:$0xf] %vm2171_vm3, %v2632_v53  ;;  %v1423_v58 = vadd.f32 %v1170_v56, %v404_v52  ;;  %v2833_v59 = vpop.f32.mrb[93].mxu0  ;;  %v1473_v0 = vadd.f32 %v1370_v60, %v454_v54  ;;  %v2933_v2 = vpop.f32.mrb[93].mxu1 }
 0x19f   : > { %2265 = vst.msk [vmem:[%s3517_s28 + $0x174] sm:$0xf] %vm2171_vm3, %v2682_v55  ;;  %v1620_v62 = vld [vmem:[#allocation2 + $0x160] sm:$0xff]  ;;  %v1173_v63 = vpop.f32.mrb[94].mxu0  ;;  %v1670_v3 = vld [vmem:[#allocation2 + $0x2f0] sm:$0xff]  ;;  %v1373_v7 = vpop.f32.mrb[94].mxu1 }
 0x1a0   : > { %v1725_v1 = vadd.f32 %v3744_v30, %v1620_v62  ;;  %1521 = vst.msk [vmem:[#allocation2 + $0x170] sm:$0xff] %vm259_vm2, %v1423_v58  ;;  %v1424_v4 = vadd.f32 %v1173_v63, %v405_v57  ;;  %v2834_v5 = vpop.f32.mrb[95].mxu0  ;;  %v1775_v9 = vadd.f32 %v3744_v30, %v1670_v3  ;;  %1571 = vst.msk [vmem:[#allocation2 + $0x300] sm:$0xff] %vm259_vm2, %v1473_v0  ;;  %v2934_v11 = vpop.f32.mrb[95].mxu1 }
 0x1a1   : > { %v1621_v8 = vld [vmem:[#allocation2 + $0x168] sm:$0xff]  ;;  %v1474_v10 = vadd.f32 %v1373_v7, %v455_v61 }
 0x1a2   : > { %v2633_v12 = vpack.c.bf16 %v1725_v1, %v1725_v1  ;;  %v1726_v13 = vadd.f32 %v3744_v30, %v1621_v8  ;;  %v1671_v14 = vld [vmem:[#allocation2 + $0x2f8] sm:$0xff]  ;;  %1522 = vst.msk [vmem:[#allocation2 + $0x178] sm:$0xff] %vm259_vm2, %v1424_v4  ;;  %v2683_v15 = vpack.c.bf16 %v1775_v9, %v1775_v9 }
 0x1a3   : > { %v1776_v16 = vadd.f32 %v3744_v30, %v1671_v14  ;;  %1572 = vst.msk [vmem:[#allocation2 + $0x308] sm:$0xff] %vm259_vm2, %v1474_v10 }
 0x1a4   : > { %2216 = vst.msk [vmem:[%s3517_s28 + $0xb0] sm:$0xf] %vm2171_vm3, %v2633_v12  ;;  %v2634_v18 = vpack.c.bf16 %v1726_v13, %v1726_v13  ;;  %2266 = vst.msk [vmem:[%s3517_s28 + $0x178] sm:$0xf] %vm2171_vm3, %v2683_v15 }
 0x1a5   : > { %v2684_v19 = vpack.c.bf16 %v1776_v16, %v1776_v16  ;;  %v1178_v20 = vpop.f32.mrb[96].mxu0 }
 0x1a6   : > { %2217 = vst.msk [vmem:[%s3517_s28 + $0xb4] sm:$0xf] %vm2171_vm3, %v2634_v18  ;;  %v1425_v22 = vadd.f32 %v1178_v20, %v406_v17  ;;  %v2837_v23 = vpop.f32.mrb[97].mxu0 }
 0x1a7   : > { %2267 = vst.msk [vmem:[%s3517_s28 + $0x17c] sm:$0xf] %vm2171_vm3, %v2684_v19  ;;  %v1622_v24 = vld [vmem:[#allocation2 + $0x170] sm:$0xff]  ;;  %v1181_v25 = vpop.f32.mrb[98].mxu0  ;;  %v1672_v6 = vld [vmem:[#allocation2 + $0x300] sm:$0xff] }
 0x1a8   : > { %v1727_v26 = vadd.f32 %v3744_v30, %v1622_v24  ;;  %1523 = vst.msk [vmem:[#allocation2 + $0x180] sm:$0xff] %vm259_vm2, %v1425_v22  ;;  %v1426_v27 = vadd.f32 %v1181_v25, %v407_v21  ;;  %v2838_v28 = vpop.f32.mrb[99].mxu0  ;;  %v1777_v31 = vadd.f32 %v3744_v30, %v1672_v6 }
 0x1a9   : > { %v1623_v29 = vld [vmem:[#allocation2 + $0x178] sm:$0xff] }
 0x1aa   : > { %v2635_v32 = vpack.c.bf16 %v1727_v26, %v1727_v26  ;;  %v1728_v33 = vadd.f32 %v3744_v30, %v1623_v29  ;;  %v1673_v34 = vld [vmem:[#allocation2 + $0x308] sm:$0xff]  ;;  %1524 = vst.msk [vmem:[#allocation2 + $0x188] sm:$0xff] %vm259_vm2, %v1426_v27  ;;  %v2685_v35 = vpack.c.bf16 %v1777_v31, %v1777_v31 }
 0x1ab   : > { %v1778_v36 = vadd.f32 %v3744_v30, %v1673_v34 }
 0x1ac   : > { %2218 = vst.msk [vmem:[%s3517_s28 + $0xb8] sm:$0xf] %vm2171_vm3, %v2635_v32  ;;  %v2636_v37 = vpack.c.bf16 %v1728_v33, %v1728_v33  ;;  %2268 = vst.msk [vmem:[%s3517_s28 + $0x180] sm:$0xf] %vm2171_vm3, %v2685_v35 }
 0x1ad   : > { %v2686_v38 = vpack.c.bf16 %v1778_v36, %v1778_v36 }
 0x1ae   : > { %2219 = vst.msk [vmem:[%s3517_s28 + $0xbc] sm:$0xf] %vm2171_vm3, %v2636_v37 }
 0x1af   : > { %2269 = vst.msk [vmem:[%s3517_s28 + $0x184] sm:$0xf] %vm2171_vm3, %v2686_v38  ;;  %v1624_v39 = vld [vmem:[#allocation2 + $0x180] sm:$0xff] }
 0x1b0   : > { %v1729_v40 = vadd.f32 %v3744_v30, %v1624_v39 }
 0x1b1   : > { %v1625_v41 = vld [vmem:[#allocation2 + $0x188] sm:$0xff] }
 0x1b2   : > { %v2637_v42 = vpack.c.bf16 %v1729_v40, %v1729_v40  ;;  %v1730_v43 = vadd.f32 %v3744_v30, %v1625_v41 }
 0x1b4   : > { %2220 = vst.msk [vmem:[%s3517_s28 + $0xc0] sm:$0xf] %vm2171_vm3, %v2637_v42  ;;  %v2638_v44 = vpack.c.bf16 %v1730_v43, %v1730_v43 }
 0x1b6   : > { %2221 = vst.msk [vmem:[%s3517_s28 + $0xc4] sm:$0xf] %vm2171_vm3, %v2638_v44 }
 0x1b7 PF: > { %s13_s14 = sadd.s32 1, %s3035_s14   ;;  %s3924_s12 = smov %s3031_s13 }
 0x1b8   : > { %p10_p5 = scmp.ge.s32.totalorder %s13_s14, 4   ;;  %s3925_s13 = smov %s3927_s15 }
 0x1ba   :  { %12 = sbr.rel (!%p10_p5) target bundleno = 2 (0x2), region = 76 }

</bundles_post_ra>
